<compile_context>
chip_gen: v7x
topology: tpu7x:2x2x1
jax: 0.10.0
libtpu: 0.0.40
codegen_flags: <defaults>
</compile_context>

<pallas_src>
import jax
import jax.numpy as jnp
from jax.experimental import pallas as pl
from jax.experimental.pallas import tpu as pltpu


# ----------------------------- Pallas kernels ------------------------------

def _gru_gates(gi, gh, h):
    """GRU gate math. gi/gh: (B, 3H) preactivations, h: (B, H) previous hidden."""
    H = h.shape[-1]
    r = jax.nn.sigmoid(gi[:, 0:H] + gh[:, 0:H])
    z = jax.nn.sigmoid(gi[:, H:2 * H] + gh[:, H:2 * H])
    n = jnp.tanh(gi[:, 2 * H:3 * H] + r * gh[:, 2 * H:3 * H])
    return (1.0 - z) * n + z * h


def input_proj_kernel(x_ref, w_ref, b_ref, o_ref):
    # Batched (all timesteps at once): (N, F) @ (F, G) + (1, G)
    o_ref[...] = (jnp.dot(x_ref[...], w_ref[...], preferred_element_type=jnp.float32)
                  + b_ref[...]).astype(o_ref.dtype)


def encoder_rnn_kernel(gif_ref, gib_ref, whh_f_ref, bhh_f_ref, whh_b_ref, bhh_b_ref,
                       outf_ref, outb_ref, hf_scr, hb_scr):
    """Fused bidirectional GRU recurrence. grid=(L,); input projections precomputed."""
    t = pl.program_id(0)

    @pl.when(t == 0)
    def _():
        hf_scr[...] = jnp.zeros_like(hf_scr)
        hb_scr[...] = jnp.zeros_like(hb_scr)

    # forward direction: time t
    hf = hf_scr[...]
    gh_f = jnp.dot(hf, whh_f_ref[...], preferred_element_type=jnp.float32) + bhh_f_ref[...]
    hf_new = _gru_gates(gif_ref[0], gh_f, hf)
    hf_scr[...] = hf_new
    outf_ref[0] = hf_new.astype(outf_ref.dtype)

    # backward direction: time L-1-t (the index_map already reversed the block order)
    hb = hb_scr[...]
    gh_b = jnp.dot(hb, whh_b_ref[...], preferred_element_type=jnp.float32) + bhh_b_ref[...]
    hb_new = _gru_gates(gib_ref[0], gh_b, hb)
    hb_scr[...] = hb_new
    outb_ref[0] = hb_new.astype(outb_ref.dtype)


def decoder_step_kernel(gix_ref, enc_ref, h0_ref, wih_c_ref, whh_ref, bhh_ref,
                        h_out_ref, ctx_out_ref, h_scr):
    """Fused attention + GRU decoder step. grid=(Lt-1,); enc/weights VMEM-resident."""
    t = pl.program_id(0)

    @pl.when(t == 0)
    def _():
        h_scr[...] = h0_ref[...].astype(jnp.float32)

    h = h_scr[...]                                                   # (B, D)
    enc = enc_ref[...]                                               # (B, L, D)

    # dot-product attention on the MXU
    h3 = h[:, None, :]                                               # (B, 1, D)
    scores = jnp.einsum('bqd,bkd->bqk', h3, enc,
                        preferred_element_type=jnp.float32)          # (B, 1, L)
    scores = scores - jnp.max(scores, axis=-1, keepdims=True)
    w = jnp.exp(scores)
    w = w * pl.reciprocal(jnp.sum(w, axis=-1, keepdims=True), approx=True)
    ctx = jnp.einsum('bqk,bkd->bqd', w, enc,
                     preferred_element_type=jnp.float32)[:, 0, :]    # (B, D)

    # GRU step; the embedding half of W_ih (+ b_ih) was pre-applied outside the loop
    gi = gix_ref[0] + jnp.dot(ctx, wih_c_ref[...], preferred_element_type=jnp.float32)
    gh = jnp.dot(h, whh_ref[...], preferred_element_type=jnp.float32) + bhh_ref[...]
    h_new = _gru_gates(gi, gh, h)

    h_scr[...] = h_new
    h_out_ref[0] = h_new.astype(h_out_ref.dtype)
    ctx_out_ref[0] = ctx.astype(ctx_out_ref.dtype)


def vocab_proj_kernel(h_ref, c_ref, wh_ref, wc_ref, b_ref, o_ref):
    # logits = [h, ctx] @ W_out + b  with W_out split so no concat is materialized.
    o = (jnp.dot(h_ref[...], wh_ref[...], preferred_element_type=jnp.float32)
         + jnp.dot(c_ref[...], wc_ref[...], preferred_element_type=jnp.float32)
         + b_ref[...])
    o_ref[...] = o.astype(o_ref.dtype)


# ----------------------------- kernel wrappers ------------------------------

_VMEM = pl.BlockSpec(memory_space=pltpu.MemorySpace.VMEM)
_ARB = pltpu.CompilerParams(dimension_semantics=("arbitrary",))


def input_proj(x, w, b):
    N = x.shape[0]
    G = w.shape[1]
    return pl.pallas_call(
        input_proj_kernel,
        out_shape=jax.ShapeDtypeStruct((N, G), jnp.float32),
        in_specs=[_VMEM] * 3,
        out_specs=_VMEM,
    )(x, w, b)


def encoder_rnn(gi_f, gi_b, w_hh_f, b_hh_f, w_hh_b, b_hh_b):
    L, B, G = gi_f.shape
    H = G // 3
    const = lambda t: (0, 0)
    fwd = lambda t: (t, 0, 0)
    bwd = lambda t: (L - 1 - t, 0, 0)
    return pl.pallas_call(
        encoder_rnn_kernel,
        out_shape=(jax.ShapeDtypeStruct((L, B, H), jnp.float32),
                   jax.ShapeDtypeStruct((L, B, H), jnp.float32)),
        grid_spec=pltpu.PrefetchScalarGridSpec(
            num_scalar_prefetch=0,
            grid=(L,),
            in_specs=[
                pl.BlockSpec((1, B, G), fwd),     # precomputed gi (forward time order)
                pl.BlockSpec((1, B, G), bwd),     # precomputed gi (reversed time order)
                pl.BlockSpec((H, G), const),      # W_hh fwd  (VMEM-resident)
                pl.BlockSpec((1, G), const),      # b_hh fwd
                pl.BlockSpec((H, G), const),      # W_hh bwd
                pl.BlockSpec((1, G), const),      # b_hh bwd
            ],
            out_specs=[
                pl.BlockSpec((1, B, H), fwd),     # forward outputs, written at time t
                pl.BlockSpec((1, B, H), bwd),     # backward outputs, written at time L-1-t
            ],
            scratch_shapes=[pltpu.VMEM((B, H), jnp.float32),   # h_forward carry
                            pltpu.VMEM((B, H), jnp.float32)],  # h_backward carry
        ),
        compiler_params=_ARB,
    )(gi_f, gi_b, w_hh_f, b_hh_f, w_hh_b, b_hh_b)


def decoder_rnn(gi_x, enc_bld, h0, w_ih_ctx, w_hh, b_hh):
    T, B, G = gi_x.shape
    D = G // 3
    L = enc_bld.shape[1]
    const2 = lambda t: (0, 0)
    const3 = lambda t: (0, 0, 0)
    step = lambda t: (t, 0, 0)
    return pl.pallas_call(
        decoder_step_kernel,
        out_shape=(jax.ShapeDtypeStruct((T, B, D), jnp.float32),
                   jax.ShapeDtypeStruct((T, B, D), jnp.float32)),
        grid_spec=pltpu.PrefetchScalarGridSpec(
            num_scalar_prefetch=0,
            grid=(T,),
            in_specs=[
                pl.BlockSpec((1, B, G), step),    # precomputed emb @ W_ih_emb + b_ih
                pl.BlockSpec((B, L, D), const3),  # encoder outputs, DMA'd once, resident
                pl.BlockSpec((B, D), const2),     # decoder initial hidden
                pl.BlockSpec((D, G), const2),     # W_ih (ctx half), resident
                pl.BlockSpec((D, G), const2),     # W_hh, resident
                pl.BlockSpec((1, G), const2),     # b_hh
            ],
            out_specs=[
                pl.BlockSpec((1, B, D), step),    # hidden per step
                pl.BlockSpec((1, B, D), step),    # attention context per step
            ],
            scratch_shapes=[pltpu.VMEM((B, D), jnp.float32)],  # hidden carry
        ),
        compiler_params=_ARB,
    )(gi_x, enc_bld, h0, w_ih_ctx, w_hh, b_hh)


def vocab_proj(h2, c2, w_out_h, w_out_c, b_out):
    N = h2.shape[0]
    V = w_out_h.shape[1]
    return pl.pallas_call(
        vocab_proj_kernel,
        out_shape=jax.ShapeDtypeStruct((N, V), jnp.float32),
        in_specs=[_VMEM] * 5,
        out_specs=_VMEM,
    )(h2, c2, w_out_h, w_out_c, b_out)


# ----------------------------- model (thin JAX glue) ------------------------

def init_params(key, vocab=128, embed=32, enc_hidden=64):
    H = enc_hidden
    D = 2 * H
    ks = jax.random.split(key, 16)
    s = 0.1

    def w(k, shape):
        return (s * jax.random.normal(k, shape)).astype(jnp.float32)

    return dict(
        enc_embed=w(ks[0], (vocab, embed)),
        # GRU weights stored transposed: (in, 3H)
        enc_w_ih_f=w(ks[1], (embed, 3 * H)), enc_w_hh_f=w(ks[2], (H, 3 * H)),
        enc_b_ih_f=w(ks[3], (1, 3 * H)),     enc_b_hh_f=w(ks[4], (1, 3 * H)),
        enc_w_ih_b=w(ks[5], (embed, 3 * H)), enc_w_hh_b=w(ks[6], (H, 3 * H)),
        enc_b_ih_b=w(ks[7], (1, 3 * H)),     enc_b_hh_b=w(ks[8], (1, 3 * H)),
        dec_embed=w(ks[9], (vocab, embed)),
        dec_w_ih=w(ks[10], (embed + D, 3 * D)), dec_w_hh=w(ks[11], (D, 3 * D)),
        dec_b_ih=w(ks[12], (1, 3 * D)),         dec_b_hh=w(ks[13], (1, 3 * D)),
        dec_w_out=w(ks[14], (2 * D, vocab)),    dec_b_out=w(ks[15], (1, vocab)),
    )


def encoder_forward(input_batch, p):
    L, B = input_batch.shape
    E = p["enc_embed"].shape[1]
    H = p["enc_w_hh_f"].shape[0]
    # TODO(synk): embedding gather kept as one bulk XLA gather; could move in-kernel via
    #             scalar-prefetched token ids if the table becomes HBM-resident.
    emb = p["enc_embed"][input_batch].reshape(L * B, E)       # (L*B, E), one bulk gather
    # hoist the non-recurrent input projections: one batched MXU matmul per direction
    gi_f = input_proj(emb, p["enc_w_ih_f"], p["enc_b_ih_f"]).reshape(L, B, 3 * H)
    gi_b = input_proj(emb, p["enc_w_ih_b"], p["enc_b_ih_b"]).reshape(L, B, 3 * H)
    out_f, out_b = encoder_rnn(gi_f, gi_b, p["enc_w_hh_f"], p["enc_b_hh_f"],
                               p["enc_w_hh_b"], p["enc_b_hh_b"])
    enc_out = jnp.concatenate([out_f, out_b], axis=-1)        # (L, B, 2H)
    # final hidden states: forward last is out_f[L-1]; backward last is out_b[0]
    enc_hidden = jnp.stack([out_f[L - 1], out_b[0]], axis=0)  # (2, B, H)
    return enc_out, enc_hidden


def combine_bidir_hidden_state(enc_hidden):
    return jnp.concatenate([enc_hidden[0], enc_hidden[1]], axis=-1)   # (B, 2H)


def decoder_forward(target_batch, hidden, enc_out, p):
    Lt, B = target_batch.shape
    E = p["dec_embed"].shape[1]
    D = p["dec_w_hh"].shape[0]
    V = p["dec_w_out"].shape[1]
    T = Lt - 1                                                 # teacher forcing: predict target[1:]
    enc_bld = jnp.transpose(enc_out, (1, 0, 2))                # (B, L, D), done once
    emb = p["dec_embed"][target_batch[:T]].reshape(T * B, E)   # one bulk gather
    # embedding half of W_ih applied to all steps at once; ctx half applied inside the kernel
    gi_x = input_proj(emb, p["dec_w_ih"][:E], p["dec_b_ih"]).reshape(T, B, 3 * D)
    h_all, ctx_all = decoder_rnn(gi_x, enc_bld, hidden, p["dec_w_ih"][E:],
                                 p["dec_w_hh"], p["dec_b_hh"])
    # batched vocab projection over all steps, W_out split -> no [h, ctx] concat
    logits = vocab_proj(h_all.reshape(T * B, D), ctx_all.reshape(T * B, D),
                        p["dec_w_out"][:D], p["dec_w_out"][D:], p["dec_b_out"])
    return logits.reshape(T, B, V)


def s2s_forward(input_batch, target_batch, params):
    enc_out, enc_hidden = encoder_forward(input_batch, params)
    dec_init = combine_bidir_hidden_state(enc_hidden)
    return decoder_forward(target_batch, dec_init, enc_out, params)


# ----------------------------- pure-JAX reference (self-check) --------------

def _gru_cell_ref(x, h, w_ih, w_hh, b_ih, b_hh):
    gi = x @ w_ih + b_ih
    gh = h @ w_hh + b_hh
    H = h.shape[-1]
    r = jax.nn.sigmoid(gi[:, :H] + gh[:, :H])
    z = jax.nn.sigmoid(gi[:, H:2 * H] + gh[:, H:2 * H])
    n = jnp.tanh(gi[:, 2 * H:] + r * gh[:, 2 * H:])
    return (1.0 - z) * n + z * h


def s2s_forward_ref(input_batch, target_batch, p):
    L, B = input_batch.shape
    H = p["enc_w_hh_f"].shape[0]
    emb = p["enc_embed"][input_batch]
    h_f = jnp.zeros((B, H), jnp.float32)
    h_b = jnp.zeros((B, H), jnp.float32)
    outs_f, outs_b = [], [None] * L
    for t in range(L):
        h_f = _gru_cell_ref(emb[t], h_f, p["enc_w_ih_f"], p["enc_w_hh_f"],
                            p["enc_b_ih_f"], p["enc_b_hh_f"])
        outs_f.append(h_f)
    for t in range(L - 1, -1, -1):
        h_b = _gru_cell_ref(emb[t], h_b, p["enc_w_ih_b"], p["enc_w_hh_b"],
                            p["enc_b_ih_b"], p["enc_b_hh_b"])
        outs_b[t] = h_b
    enc_out = jnp.concatenate([jnp.stack(outs_f, 0), jnp.stack(outs_b, 0)], axis=-1)
    h = jnp.concatenate([h_f, h_b], axis=-1)
    enc_bld = jnp.transpose(enc_out, (1, 0, 2))
    outs = []
    for t in range(target_batch.shape[0] - 1):
        e = p["dec_embed"][target_batch[t]]
        w = jax.nn.softmax(jnp.einsum('bd,bld->bl', h, enc_bld), axis=-1)
        ctx = jnp.einsum('bl,bld->bd', w, enc_bld)
        x = jnp.concatenate([e, ctx], axis=-1)
        h = _gru_cell_ref(x, h, p["dec_w_ih"], p["dec_w_hh"], p["dec_b_ih"], p["dec_b_hh"])
        outs.append(jnp.concatenate([h, ctx], axis=-1) @ p["dec_w_out"] + p["dec_b_out"])
    return jnp.stack(outs, 0)


# ----------------------------- demo ----------------------------------------

if __name__ == "__main__":
    # lane/sublane friendly small sizes: 2H = D = 128, vocab = 128, B = 8
    VOCAB, EMBED, ENC_H = 128, 32, 64
    L, B = 8, 8

    key = jax.random.PRNGKey(0)
    k_in, k_tgt, k_par = jax.random.split(key, 3)
    input_batch = jax.random.randint(k_in, (L, B), 0, VOCAB, dtype=jnp.int32)
    target_batch = jax.random.randint(k_tgt, (L, B), 0, VOCAB, dtype=jnp.int32)
    params = init_params(k_par, vocab=VOCAB, embed=EMBED, enc_hidden=ENC_H)

    fwd = jax.jit(s2s_forward)
    out = fwd(input_batch, target_batch, params)
    jax.block_until_ready(out)

    assert out.shape == (L - 1, B, VOCAB), out.shape
    assert bool(jnp.all(jnp.isfinite(out)))

    ref = jax.jit(s2s_forward_ref)(input_batch, target_batch, params)
    err = float(jnp.max(jnp.abs(out - ref)))
    assert err < 5e-2, f"max abs err vs reference: {err}"

    print("KERNEL_OK")
</pallas_src>

<mosaic_0001>
module attributes {stable_mosaic.version = 11 : i64} {
  func.func @input_proj_kernel(%arg0: memref<64x32xf32, #tpu.memory_space<vmem>>, %arg1: memref<32x192xf32, #tpu.memory_space<vmem>>, %arg2: memref<1x192xf32, #tpu.memory_space<vmem>>, %arg3: memref<64x192xf32, #tpu.memory_space<vmem>>) attributes {dimension_semantics = [], scalar_prefetch = 0 : i64, scratch_operands = 0 : i64, tpu.core_type = #tpu.core_type<tc>} {
    %c0 = arith.constant 0 : index
    %c0_0 = arith.constant 0 : index
    %0 = vector.load %arg0[%c0, %c0_0] : memref<64x32xf32, #tpu.memory_space<vmem>>, vector<64x32xf32>
    %c0_1 = arith.constant 0 : index
    %c0_2 = arith.constant 0 : index
    %1 = vector.load %arg1[%c0_1, %c0_2] : memref<32x192xf32, #tpu.memory_space<vmem>>, vector<32x192xf32>
    %cst = arith.constant dense<0.000000e+00> : vector<64x192xf32>
    %2 = tpu.matmul %0, %1, %cst {dimension_numbers = #tpu.dot_dimension_numbers<[1], [0], [0], [1], [0, 0, 1, 1], [], []>} : vector<64x32xf32>, vector<32x192xf32>, vector<64x192xf32> -> vector<64x192xf32>
    %c0_3 = arith.constant 0 : index
    %c0_4 = arith.constant 0 : index
    %3 = vector.load %arg2[%c0_3, %c0_4] : memref<1x192xf32, #tpu.memory_space<vmem>>, vector<1x192xf32>
    %4 = vector.broadcast %3 : vector<1x192xf32> to vector<64x192xf32>
    %5 = arith.addf %2, %4 : vector<64x192xf32>
    %c0_5 = arith.constant 0 : index
    %c0_6 = arith.constant 0 : index
    %6 = vector.load %arg3[%c0_5, %c0_6] : memref<64x192xf32, #tpu.memory_space<vmem>>, vector<64x192xf32>
    tpu.vector_store %arg3[%c0_5, %c0_6], %5 {strides = array<i32>} : memref<64x192xf32, #tpu.memory_space<vmem>>, vector<64x192xf32>,
    return
  }
}

module attributes {stable_mosaic.version = 11 : i64} {
  func.func @encoder_rnn_kernel(%arg0: i32, %arg1: memref<1x8x192xf32, #tpu.memory_space<vmem>>, %arg2: memref<1x8x192xf32, #tpu.memory_space<vmem>>, %arg3: memref<64x192xf32, #tpu.memory_space<vmem>>, %arg4: memref<1x192xf32, #tpu.memory_space<vmem>>, %arg5: memref<64x192xf32, #tpu.memory_space<vmem>>, %arg6: memref<1x192xf32, #tpu.memory_space<vmem>>, %arg7: memref<1x8x64xf32, #tpu.memory_space<vmem>>, %arg8: memref<1x8x64xf32, #tpu.memory_space<vmem>>, %arg9: memref<8x64xf32, #tpu.memory_space<vmem>>, %arg10: memref<8x64xf32, #tpu.memory_space<vmem>>) attributes {dimension_semantics = [#tpu.dimension_semantics<arbitrary>], iteration_bounds = array<i64: 8>, scalar_prefetch = 0 : i64, scratch_operands = 2 : i64, tpu.core_type = #tpu.core_type<tc>, window_params = [{transform_indices = @transform_0, window_bounds = array<i64: 1, 8, 192>}, {transform_indices = @transform_1, window_bounds = array<i64: 1, 8, 192>}, {pipeline_mode = #tpu.pipeline_mode<synchronous>, transform_indices = @transform_2, window_bounds = array<i64: 64, 192>}, {pipeline_mode = #tpu.pipeline_mode<synchronous>, transform_indices = @transform_3, window_bounds = array<i64: 1, 192>}, {pipeline_mode = #tpu.pipeline_mode<synchronous>, transform_indices = @transform_4, window_bounds = array<i64: 64, 192>}, {pipeline_mode = #tpu.pipeline_mode<synchronous>, transform_indices = @transform_5, window_bounds = array<i64: 1, 192>}, {transform_indices = @transform_6, window_bounds = array<i64: 1, 8, 64>}, {transform_indices = @transform_7, window_bounds = array<i64: 1, 8, 64>}]} {
    %c0_i32 = arith.constant 0 : i32
    %0 = arith.cmpi eq, %arg0, %c0_i32 : i32
    %1 = arith.extui %0 : i1 to i32
    %c0_i32_0 = arith.constant 0 : i32
    %2 = arith.cmpi ne, %1, %c0_i32_0 : i32
    scf.if %2 {
      %cst_35 = arith.constant 0.000000e+00 : f32
      %79 = vector.broadcast %cst_35 : f32 to vector<8x64xf32>
      %c0_36 = arith.constant 0 : index
      %c0_37 = arith.constant 0 : index
      %80 = vector.load %arg9[%c0_36, %c0_37] : memref<8x64xf32, #tpu.memory_space<vmem>>, vector<8x64xf32>
      tpu.vector_store %arg9[%c0_36, %c0_37], %79 {strides = array<i32>} : memref<8x64xf32, #tpu.memory_space<vmem>>, vector<8x64xf32>,
      %cst_38 = arith.constant 0.000000e+00 : f32
      %81 = vector.broadcast %cst_38 : f32 to vector<8x64xf32>
      %c0_39 = arith.constant 0 : index
      %c0_40 = arith.constant 0 : index
      %82 = vector.load %arg10[%c0_39, %c0_40] : memref<8x64xf32, #tpu.memory_space<vmem>>, vector<8x64xf32>
      tpu.vector_store %arg10[%c0_39, %c0_40], %81 {strides = array<i32>} : memref<8x64xf32, #tpu.memory_space<vmem>>, vector<8x64xf32>,
    } else {
    }
    %c0 = arith.constant 0 : index
    %c0_1 = arith.constant 0 : index
    %3 = vector.load %arg9[%c0, %c0_1] : memref<8x64xf32, #tpu.memory_space<vmem>>, vector<8x64xf32>
    %c0_2 = arith.constant 0 : index
    %c0_3 = arith.constant 0 : index
    %4 = vector.load %arg3[%c0_2, %c0_3] : memref<64x192xf32, #tpu.memory_space<vmem>>, vector<64x192xf32>
    %cst = arith.constant dense<0.000000e+00> : vector<8x192xf32>
    %5 = tpu.matmul %3, %4, %cst {dimension_numbers = #tpu.dot_dimension_numbers<[1], [0], [0], [1], [0, 0, 1, 1], [], []>} : vector<8x64xf32>, vector<64x192xf32>, vector<8x192xf32> -> vector<8x192xf32>
    %c0_4 = arith.constant 0 : index
    %c0_5 = arith.constant 0 : index
    %6 = vector.load %arg4[%c0_4, %c0_5] : memref<1x192xf32, #tpu.memory_space<vmem>>, vector<1x192xf32>
    %7 = vector.broadcast %6 : vector<1x192xf32> to vector<8x192xf32>
    %8 = arith.addf %5, %7 : vector<8x192xf32>
    %c0_6 = arith.constant 0 : index
    %c0_7 = arith.constant 0 : index
    %c0_8 = arith.constant 0 : index
    %9 = vector.load %arg1[%c0_6, %c0_7, %c0_8] : memref<1x8x192xf32, #tpu.memory_space<vmem>>, vector<1x8x192xf32>
    %10 = vector.shape_cast %9 : vector<1x8x192xf32> to vector<8x192xf32>
    %11 = vector.extract_strided_slice %10 {offsets = [0, 0], sizes = [8, 64], strides = [1, 1]} : vector<8x192xf32> to vector<8x64xf32>
    %12 = vector.extract_strided_slice %8 {offsets = [0, 0], sizes = [8, 64], strides = [1, 1]} : vector<8x192xf32> to vector<8x64xf32>
    %13 = arith.addf %11, %12 : vector<8x64xf32>
    %14 = arith.negf %13 : vector<8x64xf32>
    %15 = math.exp %14 : vector<8x64xf32>
    %cst_9 = arith.constant 1.000000e+00 : f32
    %16 = vector.broadcast %cst_9 : f32 to vector<8x64xf32>
    %17 = arith.addf %16, %15 : vector<8x64xf32>
    %18 = arith.divf %16, %17 : vector<8x64xf32>
    %19 = vector.extract_strided_slice %10 {offsets = [0, 64], sizes = [8, 64], strides = [1, 1]} : vector<8x192xf32> to vector<8x64xf32>
    %20 = vector.extract_strided_slice %8 {offsets = [0, 64], sizes = [8, 64], strides = [1, 1]} : vector<8x192xf32> to vector<8x64xf32>
    %21 = arith.addf %19, %20 : vector<8x64xf32>
    %22 = arith.negf %21 : vector<8x64xf32>
    %23 = math.exp %22 : vector<8x64xf32>
    %cst_10 = arith.constant 1.000000e+00 : f32
    %24 = vector.broadcast %cst_10 : f32 to vector<8x64xf32>
    %25 = arith.addf %24, %23 : vector<8x64xf32>
    %26 = arith.divf %24, %25 : vector<8x64xf32>
    %27 = vector.extract_strided_slice %10 {offsets = [0, 128], sizes = [8, 64], strides = [1, 1]} : vector<8x192xf32> to vector<8x64xf32>
    %28 = vector.extract_strided_slice %8 {offsets = [0, 128], sizes = [8, 64], strides = [1, 1]} : vector<8x192xf32> to vector<8x64xf32>
    %29 = arith.mulf %18, %28 : vector<8x64xf32>
    %30 = arith.addf %27, %29 : vector<8x64xf32>
    %31 = math.tanh %30 : vector<8x64xf32>
    %cst_11 = arith.constant 1.000000e+00 : f32
    %32 = vector.broadcast %cst_11 : f32 to vector<8x64xf32>
    %33 = arith.subf %32, %26 : vector<8x64xf32>
    %34 = arith.mulf %33, %31 : vector<8x64xf32>
    %35 = arith.mulf %26, %3 : vector<8x64xf32>
    %36 = arith.addf %34, %35 : vector<8x64xf32>
    %c0_12 = arith.constant 0 : index
    %c0_13 = arith.constant 0 : index
    %37 = vector.load %arg9[%c0_12, %c0_13] : memref<8x64xf32, #tpu.memory_space<vmem>>, vector<8x64xf32>
    tpu.vector_store %arg9[%c0_12, %c0_13], %36 {strides = array<i32>} : memref<8x64xf32, #tpu.memory_space<vmem>>, vector<8x64xf32>,
    %c0_14 = arith.constant 0 : index
    %c0_15 = arith.constant 0 : index
    %c0_16 = arith.constant 0 : index
    %38 = vector.load %arg7[%c0_14, %c0_15, %c0_16] : memref<1x8x64xf32, #tpu.memory_space<vmem>>, vector<1x8x64xf32>
    %39 = vector.shape_cast %38 : vector<1x8x64xf32> to vector<8x64xf32>
    %40 = vector.shape_cast %36 : vector<8x64xf32> to vector<1x8x64xf32>
    tpu.vector_store %arg7[%c0_14, %c0_15, %c0_16], %40 {strides = array<i32>} : memref<1x8x64xf32, #tpu.memory_space<vmem>>, vector<1x8x64xf32>,
    %c0_17 = arith.constant 0 : index
    %c0_18 = arith.constant 0 : index
    %41 = vector.load %arg10[%c0_17, %c0_18] : memref<8x64xf32, #tpu.memory_space<vmem>>, vector<8x64xf32>
    %c0_19 = arith.constant 0 : index
    %c0_20 = arith.constant 0 : index
    %42 = vector.load %arg5[%c0_19, %c0_20] : memref<64x192xf32, #tpu.memory_space<vmem>>, vector<64x192xf32>
    %cst_21 = arith.constant dense<0.000000e+00> : vector<8x192xf32>
    %43 = tpu.matmul %41, %42, %cst_21 {dimension_numbers = #tpu.dot_dimension_numbers<[1], [0], [0], [1], [0, 0, 1, 1], [], []>} : vector<8x64xf32>, vector<64x192xf32>, vector<8x192xf32> -> vector<8x192xf32>
    %c0_22 = arith.constant 0 : index
    %c0_23 = arith.constant 0 : index
    %44 = vector.load %arg6[%c0_22, %c0_23] : memref<1x192xf32, #tpu.memory_space<vmem>>, vector<1x192xf32>
    %45 = vector.broadcast %44 : vector<1x192xf32> to vector<8x192xf32>
    %46 = arith.addf %43, %45 : vector<8x192xf32>
    %c0_24 = arith.constant 0 : index
    %c0_25 = arith.constant 0 : index
    %c0_26 = arith.constant 0 : index
    %47 = vector.load %arg2[%c0_24, %c0_25, %c0_26] : memref<1x8x192xf32, #tpu.memory_space<vmem>>, vector<1x8x192xf32>
    %48 = vector.shape_cast %47 : vector<1x8x192xf32> to vector<8x192xf32>
    %49 = vector.extract_strided_slice %48 {offsets = [0, 0], sizes = [8, 64], strides = [1, 1]} : vector<8x192xf32> to vector<8x64xf32>
    %50 = vector.extract_strided_slice %46 {offsets = [0, 0], sizes = [8, 64], strides = [1, 1]} : vector<8x192xf32> to vector<8x64xf32>
    %51 = arith.addf %49, %50 : vector<8x64xf32>
    %52 = arith.negf %51 : vector<8x64xf32>
    %53 = math.exp %52 : vector<8x64xf32>
    %cst_27 = arith.constant 1.000000e+00 : f32
    %54 = vector.broadcast %cst_27 : f32 to vector<8x64xf32>
    %55 = arith.addf %54, %53 : vector<8x64xf32>
    %56 = arith.divf %54, %55 : vector<8x64xf32>
    %57 = vector.extract_strided_slice %48 {offsets = [0, 64], sizes = [8, 64], strides = [1, 1]} : vector<8x192xf32> to vector<8x64xf32>
    %58 = vector.extract_strided_slice %46 {offsets = [0, 64], sizes = [8, 64], strides = [1, 1]} : vector<8x192xf32> to vector<8x64xf32>
    %59 = arith.addf %57, %58 : vector<8x64xf32>
    %60 = arith.negf %59 : vector<8x64xf32>
    %61 = math.exp %60 : vector<8x64xf32>
    %cst_28 = arith.constant 1.000000e+00 : f32
    %62 = vector.broadcast %cst_28 : f32 to vector<8x64xf32>
    %63 = arith.addf %62, %61 : vector<8x64xf32>
    %64 = arith.divf %62, %63 : vector<8x64xf32>
    %65 = vector.extract_strided_slice %48 {offsets = [0, 128], sizes = [8, 64], strides = [1, 1]} : vector<8x192xf32> to vector<8x64xf32>
    %66 = vector.extract_strided_slice %46 {offsets = [0, 128], sizes = [8, 64], strides = [1, 1]} : vector<8x192xf32> to vector<8x64xf32>
    %67 = arith.mulf %56, %66 : vector<8x64xf32>
    %68 = arith.addf %65, %67 : vector<8x64xf32>
    %69 = math.tanh %68 : vector<8x64xf32>
    %cst_29 = arith.constant 1.000000e+00 : f32
    %70 = vector.broadcast %cst_29 : f32 to vector<8x64xf32>
    %71 = arith.subf %70, %64 : vector<8x64xf32>
    %72 = arith.mulf %71, %69 : vector<8x64xf32>
    %73 = arith.mulf %64, %41 : vector<8x64xf32>
    %74 = arith.addf %72, %73 : vector<8x64xf32>
    %c0_30 = arith.constant 0 : index
    %c0_31 = arith.constant 0 : index
    %75 = vector.load %arg10[%c0_30, %c0_31] : memref<8x64xf32, #tpu.memory_space<vmem>>, vector<8x64xf32>
    tpu.vector_store %arg10[%c0_30, %c0_31], %74 {strides = array<i32>} : memref<8x64xf32, #tpu.memory_space<vmem>>, vector<8x64xf32>,
    %c0_32 = arith.constant 0 : index
    %c0_33 = arith.constant 0 : index
    %c0_34 = arith.constant 0 : index
    %76 = vector.load %arg8[%c0_32, %c0_33, %c0_34] : memref<1x8x64xf32, #tpu.memory_space<vmem>>, vector<1x8x64xf32>
    %77 = vector.shape_cast %76 : vector<1x8x64xf32> to vector<8x64xf32>
    %78 = vector.shape_cast %74 : vector<8x64xf32> to vector<1x8x64xf32>
    tpu.vector_store %arg8[%c0_32, %c0_33, %c0_34], %78 {strides = array<i32>} : memref<1x8x64xf32, #tpu.memory_space<vmem>>, vector<1x8x64xf32>,
    return
  }
  func.func @transform_0(%arg0: i32) -> (i32, i32, i32) {
    %c0_i32 = arith.constant 0 : i32
    %c0_i32_0 = arith.constant 0 : i32
    %c0_i32_1 = arith.constant 0 : i32
    return %arg0, %c0_i32, %c0_i32_0 : i32, i32, i32
  }
  func.func @transform_1(%arg0: i32) -> (i32, i32, i32) {
    %c7_i32 = arith.constant 7 : i32
    %0 = arith.subi %c7_i32, %arg0 : i32
    %c0_i32 = arith.constant 0 : i32
    %c0_i32_0 = arith.constant 0 : i32
    %c0_i32_1 = arith.constant 0 : i32
    return %0, %c0_i32, %c0_i32_0 : i32, i32, i32
  }
  func.func @transform_2(%arg0: i32) -> (i32, i32) {
    %c0_i32 = arith.constant 0 : i32
    %c0_i32_0 = arith.constant 0 : i32
    %c0_i32_1 = arith.constant 0 : i32
    return %c0_i32, %c0_i32_0 : i32, i32
  }
  func.func @transform_3(%arg0: i32) -> (i32, i32) {
    %c0_i32 = arith.constant 0 : i32
    %c0_i32_0 = arith.constant 0 : i32
    %c0_i32_1 = arith.constant 0 : i32
    return %c0_i32, %c0_i32_0 : i32, i32
  }
  func.func @transform_4(%arg0: i32) -> (i32, i32) {
    %c0_i32 = arith.constant 0 : i32
    %c0_i32_0 = arith.constant 0 : i32
    %c0_i32_1 = arith.constant 0 : i32
    return %c0_i32, %c0_i32_0 : i32, i32
  }
  func.func @transform_5(%arg0: i32) -> (i32, i32) {
    %c0_i32 = arith.constant 0 : i32
    %c0_i32_0 = arith.constant 0 : i32
    %c0_i32_1 = arith.constant 0 : i32
    return %c0_i32, %c0_i32_0 : i32, i32
  }
  func.func @transform_6(%arg0: i32) -> (i32, i32, i32) {
    %c0_i32 = arith.constant 0 : i32
    %c0_i32_0 = arith.constant 0 : i32
    %c0_i32_1 = arith.constant 0 : i32
    return %arg0, %c0_i32, %c0_i32_0 : i32, i32, i32
  }
  func.func @transform_7(%arg0: i32) -> (i32, i32, i32) {
    %c7_i32 = arith.constant 7 : i32
    %0 = arith.subi %c7_i32, %arg0 : i32
    %c0_i32 = arith.constant 0 : i32
    %c0_i32_0 = arith.constant 0 : i32
    %c0_i32_1 = arith.constant 0 : i32
    return %0, %c0_i32, %c0_i32_0 : i32, i32, i32
  }
}

module attributes {stable_mosaic.version = 11 : i64} {
  func.func @input_proj_kernel(%arg0: memref<56x32xf32, #tpu.memory_space<vmem>>, %arg1: memref<32x384xf32, #tpu.memory_space<vmem>>, %arg2: memref<1x384xf32, #tpu.memory_space<vmem>>, %arg3: memref<56x384xf32, #tpu.memory_space<vmem>>) attributes {dimension_semantics = [], scalar_prefetch = 0 : i64, scratch_operands = 0 : i64, tpu.core_type = #tpu.core_type<tc>} {
    %c0 = arith.constant 0 : index
    %c0_0 = arith.constant 0 : index
    %0 = vector.load %arg0[%c0, %c0_0] : memref<56x32xf32, #tpu.memory_space<vmem>>, vector<56x32xf32>
    %c0_1 = arith.constant 0 : index
    %c0_2 = arith.constant 0 : index
    %1 = vector.load %arg1[%c0_1, %c0_2] : memref<32x384xf32, #tpu.memory_space<vmem>>, vector<32x384xf32>
    %cst = arith.constant dense<0.000000e+00> : vector<56x384xf32>
    %2 = tpu.matmul %0, %1, %cst {dimension_numbers = #tpu.dot_dimension_numbers<[1], [0], [0], [1], [0, 0, 1, 1], [], []>} : vector<56x32xf32>, vector<32x384xf32>, vector<56x384xf32> -> vector<56x384xf32>
    %c0_3 = arith.constant 0 : index
    %c0_4 = arith.constant 0 : index
    %3 = vector.load %arg2[%c0_3, %c0_4] : memref<1x384xf32, #tpu.memory_space<vmem>>, vector<1x384xf32>
    %4 = vector.broadcast %3 : vector<1x384xf32> to vector<56x384xf32>
    %5 = arith.addf %2, %4 : vector<56x384xf32>
    %c0_5 = arith.constant 0 : index
    %c0_6 = arith.constant 0 : index
    %6 = vector.load %arg3[%c0_5, %c0_6] : memref<56x384xf32, #tpu.memory_space<vmem>>, vector<56x384xf32>
    tpu.vector_store %arg3[%c0_5, %c0_6], %5 {strides = array<i32>} : memref<56x384xf32, #tpu.memory_space<vmem>>, vector<56x384xf32>,
    return
  }
}

module attributes {stable_mosaic.version = 11 : i64} {
  func.func @decoder_step_kernel(%arg0: i32, %arg1: memref<1x8x384xf32, #tpu.memory_space<vmem>>, %arg2: memref<8x8x128xf32, #tpu.memory_space<vmem>>, %arg3: memref<8x128xf32, #tpu.memory_space<vmem>>, %arg4: memref<128x384xf32, #tpu.memory_space<vmem>>, %arg5: memref<128x384xf32, #tpu.memory_space<vmem>>, %arg6: memref<1x384xf32, #tpu.memory_space<vmem>>, %arg7: memref<1x8x128xf32, #tpu.memory_space<vmem>>, %arg8: memref<1x8x128xf32, #tpu.memory_space<vmem>>, %arg9: memref<8x128xf32, #tpu.memory_space<vmem>>) attributes {dimension_semantics = [#tpu.dimension_semantics<arbitrary>], iteration_bounds = array<i64: 7>, scalar_prefetch = 0 : i64, scratch_operands = 1 : i64, tpu.core_type = #tpu.core_type<tc>, window_params = [{transform_indices = @transform_0, window_bounds = array<i64: 1, 8, 384>}, {pipeline_mode = #tpu.pipeline_mode<synchronous>, transform_indices = @transform_1, window_bounds = array<i64: 8, 8, 128>}, {pipeline_mode = #tpu.pipeline_mode<synchronous>, transform_indices = @transform_2, window_bounds = array<i64: 8, 128>}, {pipeline_mode = #tpu.pipeline_mode<synchronous>, transform_indices = @transform_3, window_bounds = array<i64: 128, 384>}, {pipeline_mode = #tpu.pipeline_mode<synchronous>, transform_indices = @transform_4, window_bounds = array<i64: 128, 384>}, {pipeline_mode = #tpu.pipeline_mode<synchronous>, transform_indices = @transform_5, window_bounds = array<i64: 1, 384>}, {transform_indices = @transform_6, window_bounds = array<i64: 1, 8, 128>}, {transform_indices = @transform_7, window_bounds = array<i64: 1, 8, 128>}]} {
    %c0_i32 = arith.constant 0 : i32
    %0 = arith.cmpi eq, %arg0, %c0_i32 : i32
    %1 = arith.extui %0 : i1 to i32
    %c0_i32_0 = arith.constant 0 : i32
    %2 = arith.cmpi ne, %1, %c0_i32_0 : i32
    scf.if %2 {
      %c0_30 = arith.constant 0 : index
      %c0_31 = arith.constant 0 : index
      %62 = vector.load %arg3[%c0_30, %c0_31] : memref<8x128xf32, #tpu.memory_space<vmem>>, vector<8x128xf32>
      %c0_32 = arith.constant 0 : index
      %c0_33 = arith.constant 0 : index
      %63 = vector.load %arg9[%c0_32, %c0_33] : memref<8x128xf32, #tpu.memory_space<vmem>>, vector<8x128xf32>
      tpu.vector_store %arg9[%c0_32, %c0_33], %62 {strides = array<i32>} : memref<8x128xf32, #tpu.memory_space<vmem>>, vector<8x128xf32>,
    } else {
    }
    %c0 = arith.constant 0 : index
    %c0_1 = arith.constant 0 : index
    %3 = vector.load %arg9[%c0, %c0_1] : memref<8x128xf32, #tpu.memory_space<vmem>>, vector<8x128xf32>
    %c0_2 = arith.constant 0 : index
    %c0_3 = arith.constant 0 : index
    %c0_4 = arith.constant 0 : index
    %4 = vector.load %arg2[%c0_2, %c0_3, %c0_4] : memref<8x8x128xf32, #tpu.memory_space<vmem>>, vector<8x8x128xf32>
    %5 = vector.shape_cast %3 : vector<8x128xf32> to vector<8x1x128xf32>
    "tpu.trace_start"() <{level = 10 : i32, message = "bqd,bkd->bqk"}> : () -> ()
    %cst = arith.constant dense<0.000000e+00> : vector<8x1x8xf32>
    %6 = tpu.matmul %5, %4, %cst {dimension_numbers = #tpu.dot_dimension_numbers<[2], [2], [1], [1], [0, 0, 0, 1, 1, 1], [0], [0]>} : vector<8x1x128xf32>, vector<8x8x128xf32>, vector<8x1x8xf32> -> vector<8x1x8xf32>
    "tpu.trace_stop"() : () -> ()
    %cst_5 = arith.constant dense<0xFF800000> : vector<8x1xf32>
    %7 = vector.multi_reduction <maximumf>, %6, %cst_5 [2] : vector<8x1x8xf32> to vector<8x1xf32>
    %8 = vector.shape_cast %7 : vector<8x1xf32> to vector<8x1x1xf32>
    %9 = vector.broadcast %8 : vector<8x1x1xf32> to vector<8x1x8xf32>
    %10 = arith.subf %6, %9 : vector<8x1x8xf32>
    %11 = math.exp %10 : vector<8x1x8xf32>
    %cst_6 = arith.constant dense<0.000000e+00> : vector<8x1xf32>
    %12 = vector.multi_reduction <add>, %11, %cst_6 [2] : vector<8x1x8xf32> to vector<8x1xf32>
    %13 = vector.shape_cast %12 : vector<8x1xf32> to vector<8x1x1xf32>
    %14 = tpu.reciprocal %13 {approx = true} : vector<8x1x1xf32> -> vector<8x1x1xf32>
    %15 = vector.broadcast %14 : vector<8x1x1xf32> to vector<8x1x8xf32>
    %16 = arith.mulf %11, %15 : vector<8x1x8xf32>
    "tpu.trace_start"() <{level = 10 : i32, message = "bqk,bkd->bqd"}> : () -> ()
    %cst_7 = arith.constant dense<0.000000e+00> : vector<8x1x128xf32>
    %17 = tpu.matmul %16, %4, %cst_7 {dimension_numbers = #tpu.dot_dimension_numbers<[2], [1], [1], [2], [0, 0, 0, 1, 1, 2], [0], [0]>} : vector<8x1x8xf32>, vector<8x8x128xf32>, vector<8x1x128xf32> -> vector<8x1x128xf32>
    "tpu.trace_stop"() : () -> ()
    %18 = vector.shape_cast %17 : vector<8x1x128xf32> to vector<8x128xf32>
    %c0_8 = arith.constant 0 : index
    %c0_9 = arith.constant 0 : index
    %c0_10 = arith.constant 0 : index
    %19 = vector.load %arg1[%c0_8, %c0_9, %c0_10] : memref<1x8x384xf32, #tpu.memory_space<vmem>>, vector<1x8x384xf32>
    %20 = vector.shape_cast %19 : vector<1x8x384xf32> to vector<8x384xf32>
    %c0_11 = arith.constant 0 : index
    %c0_12 = arith.constant 0 : index
    %21 = vector.load %arg4[%c0_11, %c0_12] : memref<128x384xf32, #tpu.memory_space<vmem>>, vector<128x384xf32>
    %cst_13 = arith.constant dense<0.000000e+00> : vector<8x384xf32>
    %22 = tpu.matmul %18, %21, %cst_13 {dimension_numbers = #tpu.dot_dimension_numbers<[1], [0], [0], [1], [0, 0, 1, 1], [], []>} : vector<8x128xf32>, vector<128x384xf32>, vector<8x384xf32> -> vector<8x384xf32>
    %23 = arith.addf %20, %22 : vector<8x384xf32>
    %c0_14 = arith.constant 0 : index
    %c0_15 = arith.constant 0 : index
    %24 = vector.load %arg5[%c0_14, %c0_15] : memref<128x384xf32, #tpu.memory_space<vmem>>, vector<128x384xf32>
    %cst_16 = arith.constant dense<0.000000e+00> : vector<8x384xf32>
    %25 = tpu.matmul %3, %24, %cst_16 {dimension_numbers = #tpu.dot_dimension_numbers<[1], [0], [0], [1], [0, 0, 1, 1], [], []>} : vector<8x128xf32>, vector<128x384xf32>, vector<8x384xf32> -> vector<8x384xf32>
    %c0_17 = arith.constant 0 : index
    %c0_18 = arith.constant 0 : index
    %26 = vector.load %arg6[%c0_17, %c0_18] : memref<1x384xf32, #tpu.memory_space<vmem>>, vector<1x384xf32>
    %27 = vector.broadcast %26 : vector<1x384xf32> to vector<8x384xf32>
    %28 = arith.addf %25, %27 : vector<8x384xf32>
    %29 = vector.extract_strided_slice %23 {offsets = [0, 0], sizes = [8, 128], strides = [1, 1]} : vector<8x384xf32> to vector<8x128xf32>
    %30 = vector.extract_strided_slice %28 {offsets = [0, 0], sizes = [8, 128], strides = [1, 1]} : vector<8x384xf32> to vector<8x128xf32>
    %31 = arith.addf %29, %30 : vector<8x128xf32>
    %32 = arith.negf %31 : vector<8x128xf32>
    %33 = math.exp %32 : vector<8x128xf32>
    %cst_19 = arith.constant 1.000000e+00 : f32
    %34 = vector.broadcast %cst_19 : f32 to vector<8x128xf32>
    %35 = arith.addf %34, %33 : vector<8x128xf32>
    %36 = arith.divf %34, %35 : vector<8x128xf32>
    %37 = vector.extract_strided_slice %23 {offsets = [0, 128], sizes = [8, 128], strides = [1, 1]} : vector<8x384xf32> to vector<8x128xf32>
    %38 = vector.extract_strided_slice %28 {offsets = [0, 128], sizes = [8, 128], strides = [1, 1]} : vector<8x384xf32> to vector<8x128xf32>
    %39 = arith.addf %37, %38 : vector<8x128xf32>
    %40 = arith.negf %39 : vector<8x128xf32>
    %41 = math.exp %40 : vector<8x128xf32>
    %cst_20 = arith.constant 1.000000e+00 : f32
    %42 = vector.broadcast %cst_20 : f32 to vector<8x128xf32>
    %43 = arith.addf %42, %41 : vector<8x128xf32>
    %44 = arith.divf %42, %43 : vector<8x128xf32>
    %45 = vector.extract_strided_slice %23 {offsets = [0, 256], sizes = [8, 128], strides = [1, 1]} : vector<8x384xf32> to vector<8x128xf32>
    %46 = vector.extract_strided_slice %28 {offsets = [0, 256], sizes = [8, 128], strides = [1, 1]} : vector<8x384xf32> to vector<8x128xf32>
    %47 = arith.mulf %36, %46 : vector<8x128xf32>
    %48 = arith.addf %45, %47 : vector<8x128xf32>
    %49 = math.tanh %48 : vector<8x128xf32>
    %cst_21 = arith.constant 1.000000e+00 : f32
    %50 = vector.broadcast %cst_21 : f32 to vector<8x128xf32>
    %51 = arith.subf %50, %44 : vector<8x128xf32>
    %52 = arith.mulf %51, %49 : vector<8x128xf32>
    %53 = arith.mulf %44, %3 : vector<8x128xf32>
    %54 = arith.addf %52, %53 : vector<8x128xf32>
    %c0_22 = arith.constant 0 : index
    %c0_23 = arith.constant 0 : index
    %55 = vector.load %arg9[%c0_22, %c0_23] : memref<8x128xf32, #tpu.memory_space<vmem>>, vector<8x128xf32>
    tpu.vector_store %arg9[%c0_22, %c0_23], %54 {strides = array<i32>} : memref<8x128xf32, #tpu.memory_space<vmem>>, vector<8x128xf32>,
    %c0_24 = arith.constant 0 : index
    %c0_25 = arith.constant 0 : index
    %c0_26 = arith.constant 0 : index
    %56 = vector.load %arg7[%c0_24, %c0_25, %c0_26] : memref<1x8x128xf32, #tpu.memory_space<vmem>>, vector<1x8x128xf32>
    %57 = vector.shape_cast %56 : vector<1x8x128xf32> to vector<8x128xf32>
    %58 = vector.shape_cast %54 : vector<8x128xf32> to vector<1x8x128xf32>
    tpu.vector_store %arg7[%c0_24, %c0_25, %c0_26], %58 {strides = array<i32>} : memref<1x8x128xf32, #tpu.memory_space<vmem>>, vector<1x8x128xf32>,
    %c0_27 = arith.constant 0 : index
    %c0_28 = arith.constant 0 : index
    %c0_29 = arith.constant 0 : index
    %59 = vector.load %arg8[%c0_27, %c0_28, %c0_29] : memref<1x8x128xf32, #tpu.memory_space<vmem>>, vector<1x8x128xf32>
    %60 = vector.shape_cast %59 : vector<1x8x128xf32> to vector<8x128xf32>
    %61 = vector.shape_cast %18 : vector<8x128xf32> to vector<1x8x128xf32>
    tpu.vector_store %arg8[%c0_27, %c0_28, %c0_29], %61 {strides = array<i32>} : memref<1x8x128xf32, #tpu.memory_space<vmem>>, vector<1x8x128xf32>,
    return
  }
  func.func @transform_0(%arg0: i32) -> (i32, i32, i32) {
    %c0_i32 = arith.constant 0 : i32
    %c0_i32_0 = arith.constant 0 : i32
    %c0_i32_1 = arith.constant 0 : i32
    return %arg0, %c0_i32, %c0_i32_0 : i32, i32, i32
  }
  func.func @transform_1(%arg0: i32) -> (i32, i32, i32) {
    %c0_i32 = arith.constant 0 : i32
    %c0_i32_0 = arith.constant 0 : i32
    %c0_i32_1 = arith.constant 0 : i32
    %c0_i32_2 = arith.constant 0 : i32
    return %c0_i32, %c0_i32_0, %c0_i32_1 : i32, i32, i32
  }
  func.func @transform_2(%arg0: i32) -> (i32, i32) {
    %c0_i32 = arith.constant 0 : i32
    %c0_i32_0 = arith.constant 0 : i32
    %c0_i32_1 = arith.constant 0 : i32
    return %c0_i32, %c0_i32_0 : i32, i32
  }
  func.func @transform_3(%arg0: i32) -> (i32, i32) {
    %c0_i32 = arith.constant 0 : i32
    %c0_i32_0 = arith.constant 0 : i32
    %c0_i32_1 = arith.constant 0 : i32
    return %c0_i32, %c0_i32_0 : i32, i32
  }
  func.func @transform_4(%arg0: i32) -> (i32, i32) {
    %c0_i32 = arith.constant 0 : i32
    %c0_i32_0 = arith.constant 0 : i32
    %c0_i32_1 = arith.constant 0 : i32
    return %c0_i32, %c0_i32_0 : i32, i32
  }
  func.func @transform_5(%arg0: i32) -> (i32, i32) {
    %c0_i32 = arith.constant 0 : i32
    %c0_i32_0 = arith.constant 0 : i32
    %c0_i32_1 = arith.constant 0 : i32
    return %c0_i32, %c0_i32_0 : i32, i32
  }
  func.func @transform_6(%arg0: i32) -> (i32, i32, i32) {
    %c0_i32 = arith.constant 0 : i32
    %c0_i32_0 = arith.constant 0 : i32
    %c0_i32_1 = arith.constant 0 : i32
    return %arg0, %c0_i32, %c0_i32_0 : i32, i32, i32
  }
  func.func @transform_7(%arg0: i32) -> (i32, i32, i32) {
    %c0_i32 = arith.constant 0 : i32
    %c0_i32_0 = arith.constant 0 : i32
    %c0_i32_1 = arith.constant 0 : i32
    return %arg0, %c0_i32, %c0_i32_0 : i32, i32, i32
  }
}

module attributes {stable_mosaic.version = 11 : i64} {
  func.func @vocab_proj_kernel(%arg0: memref<56x128xf32, #tpu.memory_space<vmem>>, %arg1: memref<56x128xf32, #tpu.memory_space<vmem>>, %arg2: memref<128x128xf32, #tpu.memory_space<vmem>>, %arg3: memref<128x128xf32, #tpu.memory_space<vmem>>, %arg4: memref<1x128xf32, #tpu.memory_space<vmem>>, %arg5: memref<56x128xf32, #tpu.memory_space<vmem>>) attributes {dimension_semantics = [], scalar_prefetch = 0 : i64, scratch_operands = 0 : i64, tpu.core_type = #tpu.core_type<tc>} {
    %c0 = arith.constant 0 : index
    %c0_0 = arith.constant 0 : index
    %0 = vector.load %arg0[%c0, %c0_0] : memref<56x128xf32, #tpu.memory_space<vmem>>, vector<56x128xf32>
    %c0_1 = arith.constant 0 : index
    %c0_2 = arith.constant 0 : index
    %1 = vector.load %arg2[%c0_1, %c0_2] : memref<128x128xf32, #tpu.memory_space<vmem>>, vector<128x128xf32>
    %cst = arith.constant dense<0.000000e+00> : vector<56x128xf32>
    %2 = tpu.matmul %0, %1, %cst {dimension_numbers = #tpu.dot_dimension_numbers<[1], [0], [0], [1], [0, 0, 1, 1], [], []>} : vector<56x128xf32>, vector<128x128xf32>, vector<56x128xf32> -> vector<56x128xf32>
    %c0_3 = arith.constant 0 : index
    %c0_4 = arith.constant 0 : index
    %3 = vector.load %arg1[%c0_3, %c0_4] : memref<56x128xf32, #tpu.memory_space<vmem>>, vector<56x128xf32>
    %c0_5 = arith.constant 0 : index
    %c0_6 = arith.constant 0 : index
    %4 = vector.load %arg3[%c0_5, %c0_6] : memref<128x128xf32, #tpu.memory_space<vmem>>, vector<128x128xf32>
    %cst_7 = arith.constant dense<0.000000e+00> : vector<56x128xf32>
    %5 = tpu.matmul %3, %4, %cst_7 {dimension_numbers = #tpu.dot_dimension_numbers<[1], [0], [0], [1], [0, 0, 1, 1], [], []>} : vector<56x128xf32>, vector<128x128xf32>, vector<56x128xf32> -> vector<56x128xf32>
    %6 = arith.addf %2, %5 : vector<56x128xf32>
    %c0_8 = arith.constant 0 : index
    %c0_9 = arith.constant 0 : index
    %7 = vector.load %arg4[%c0_8, %c0_9] : memref<1x128xf32, #tpu.memory_space<vmem>>, vector<1x128xf32>
    %8 = vector.broadcast %7 : vector<1x128xf32> to vector<56x128xf32>
    %9 = arith.addf %6, %8 : vector<56x128xf32>
    %c0_10 = arith.constant 0 : index
    %c0_11 = arith.constant 0 : index
    %10 = vector.load %arg5[%c0_10, %c0_11] : memref<56x128xf32, #tpu.memory_space<vmem>>, vector<56x128xf32>
    tpu.vector_store %arg5[%c0_10, %c0_11], %9 {strides = array<i32>} : memref<56x128xf32, #tpu.memory_space<vmem>>, vector<56x128xf32>,
    return
  }
}

</mosaic_0001>

<bundles_post_ra>
// kernel: s2s_forward.6
= control target key start
LH: loop header
LB: loop body
LE: loop exit
PB: predicated region body
PF: predicated region fallthrough
CT: control target
= control target key end

     0   :  { %v222_v3 = vmov 0.0   ;;  %vm42_vm0 = vcmask 261120   ;;  %v32_v21 = vlaneseq  ;;  %vm181_vm1 = vcmask 523264   ;;  %s358_s1 = inlined_call_operand.vmem [shape: f32[32,192], index: 1, kind: input, shape index: {}]   ;;  %s359_s0 = inlined_call_operand.vmem [shape: f32[64,32], index: 0, kind: input, shape index: {}]   ;;  %s360_s2 = inlined_call_operand.vmem [shape: f32[1,192], index: 2, kind: input, shape index: {}]   ;;  %s361_s3 = inlined_call_operand.vmem [shape: f32[64,192], index: 3, kind: output, shape index: {}]  }
   0x1   :  { %v23_v0 = vld [vmem:[%s358_s1 + $0x8] sm:$0xff]  ;;  %v25_v1 = vld [vmem:[%s358_s1 + $0x18] sm:$0xff]  ;;  %v22_v2 = vld [vmem:[%s358_s1] sm:$0xff]  ;;  %131 = vmatprep.mubr.f32.mxu0 %v222_v3  ;;  %155 = vmatprep.mubr.f32.mxu1 %v222_v3 }
   0x2   :  { %v209_v4 = vpack.c.bf16 %v25_v1, %v23_v0  ;;  %v24_v5 = vld [vmem:[%s358_s1 + $0x10] sm:$0xff]  ;;  %v27_v6 = vld [vmem:[%s358_s1 + $0x28] sm:$0xff]  ;;  %v29_v7 = vld [vmem:[%s358_s1 + $0x38] sm:$0xff]  ;;  %v33_v22 = vshrl.u32 %v32_v21, 7 }
   0x3   :  { %v211_v8 = vpack.c.bf16 %v24_v5, %v22_v2  ;;  %v213_v9 = vpack.c.bf16 %v29_v7, %v27_v6  ;;  %v26_v10 = vld [vmem:[%s358_s1 + $0x20] sm:$0xff]  ;;  %v28_v11 = vld [vmem:[%s358_s1 + $0x30] sm:$0xff]  ;;  %v15_v15 = vld [vmem:[%s359_s0 + $0x8] sm:$0xff] }
   0x4   :  { %210 = vmatprep.subr.bf16.mxu0 %v209_v4  ;;  %217 = vmatprep.subr.bf16.mxu1 %v209_v4  ;;  %v215_v12 = vpack.c.bf16 %v28_v11, %v26_v10  ;;  %v14_v13 = vld [vmem:[%s359_s0] sm:$0xff]  ;;  %v19_v16 = vld [vmem:[%s359_s0 + $0x28] sm:$0xff]  ;;  %v16_v17 = vld [vmem:[%s359_s0 + $0x10] sm:$0xff]  ;;  %v34_v23 = vsub.s32 0, %v33_v22  ;;  %v38_v25 = vsub.s32 1, %v33_v22 }
   0x5   :  { %212 = vmatpush1.bf16.msra.mxu0 %v211_v8  ;;  %219 = vmatpush1.bf16.msra.mxu1 %v211_v8  ;;  %v18_v14 = vld [vmem:[%s359_s0 + $0x20] sm:$0xff]  ;;  %v20_v18 = vld [vmem:[%s359_s0 + $0x30] sm:$0xff]  ;;  %v17_v19 = vld [vmem:[%s359_s0 + $0x18] sm:$0xff] }
   0x6   :  { %214 = vmatprep.subr.bf16.mxu0 %v213_v9  ;;  %218 = vmatprep.subr.bf16.mxu1 %v213_v9  ;;  %v21_v20 = vld [vmem:[%s359_s0 + $0x38] sm:$0xff]  ;;  %v30_v24 = vld [vmem:[%s360_s2] sm:$0x3] }
   0x7   :  { %v35_v26 = vrot.slane %v30_v24, %v34_v23  ;;  %v39_v27 = vrot.slane %v30_v24, %v38_v25 }
   0x9   :  { %216 = vmatpush1.bf16.msra.mxu0 %v215_v12  ;;  %220 = vmatpush1.bf16.msra.mxu1 %v215_v12 }
   0xc   :  { %201 = vmatmul.mubr.msk.f32.vlgmr.msra.gmra.mrb[0].mxu0 %vm42_vm0, %v14_v13  ;;  %205 = vmatmul.mubr.msk.f32.vlgmr.msra.gmra.mrb[0].mxu1 %vm42_vm0, %v18_v14 }
   0xd   :  { %137 = vmatprep.mubr.f32.mxu0 %v222_v3  ;;  %161 = vmatprep.mubr.f32.mxu1 %v222_v3 }
  0x10   :  { %202 = vmatmul.mubr.msk.f32.gmra.mrb[2].mxu0 %vm42_vm0, %v15_v15  ;;  %206 = vmatmul.mubr.msk.f32.gmra.mrb[2].mxu1 %vm42_vm0, %v19_v16 }
  0x11   :  { %143 = vmatprep.mubr.f32.mxu0 %v222_v3  ;;  %167 = vmatprep.mubr.f32.mxu1 %v222_v3 }
  0x14   :  { %203 = vmatmul.mubr.msk.f32.gmra.mrb[4].mxu0 %vm42_vm0, %v16_v17  ;;  %207 = vmatmul.mubr.msk.f32.gmra.mrb[4].mxu1 %vm42_vm0, %v20_v18 }
  0x15   :  { %149 = vmatprep.mubr.f32.mxu0 %v222_v3  ;;  %173 = vmatprep.mubr.f32.mxu1 %v222_v3 }
  0x18   :  { %204 = vmatmul.mubr.msk.f32.gmra.mrb[6].mxu0 %vm42_vm0, %v17_v19  ;;  %208 = vmatmul.mubr.msk.f32.gmra.mrb[6].mxu1 %vm42_vm0, %v21_v20 }
  0xdf   :  { %v133_v28 = vpop.f32.mrb[0].mxu0  ;;  %v157_v29 = vpop.f32.mrb[0].mxu1 }
  0xe0   :  { %v134_v30 = vadd.f32 %v133_v28, %v35_v26  ;;  %v158_v31 = vadd.f32 %v157_v29, %v35_v26  ;;  %v135_v32 = vpop.f32.mrb[1].mxu0  ;;  %v159_v33 = vpop.f32.mrb[1].mxu1 }
  0xe1   :  { %v136_v34 = vadd.f32 %v135_v32, %v39_v27  ;;  %v160_v35 = vadd.f32 %v159_v33, %v39_v27 }
  0xe2   :  { %180 = vst [vmem:[%s361_s3] sm:$0xff] %v134_v30  ;;  %189 = vst [vmem:[%s361_s3 + $0x40] sm:$0xff] %v158_v31 }
  0xe3   :  { %182 = vst.msk [vmem:[%s361_s3 + $0x8] sm:$0xff] %vm181_vm1, %v136_v34  ;;  %190 = vst.msk [vmem:[%s361_s3 + $0x48] sm:$0xff] %vm181_vm1, %v160_v35  ;;  %v139_v36 = vpop.f32.mrb[2].mxu0  ;;  %v163_v37 = vpop.f32.mrb[2].mxu1 }
  0xe4   :  { %v140_v38 = vadd.f32 %v139_v36, %v35_v26  ;;  %v164_v39 = vadd.f32 %v163_v37, %v35_v26  ;;  %v141_v40 = vpop.f32.mrb[3].mxu0  ;;  %v165_v41 = vpop.f32.mrb[3].mxu1 }
  0xe5   :  { %v142_v42 = vadd.f32 %v141_v40, %v39_v27  ;;  %v166_v43 = vadd.f32 %v165_v41, %v39_v27 }
  0xe6   :  { %183 = vst [vmem:[%s361_s3 + $0x10] sm:$0xff] %v140_v38  ;;  %191 = vst [vmem:[%s361_s3 + $0x50] sm:$0xff] %v164_v39 }
  0xe7   :  { %184 = vst.msk [vmem:[%s361_s3 + $0x18] sm:$0xff] %vm181_vm1, %v142_v42  ;;  %192 = vst.msk [vmem:[%s361_s3 + $0x58] sm:$0xff] %vm181_vm1, %v166_v43  ;;  %v145_v44 = vpop.f32.mrb[4].mxu0  ;;  %v169_v45 = vpop.f32.mrb[4].mxu1 }
  0xe8   :  { %v146_v46 = vadd.f32 %v145_v44, %v35_v26  ;;  %v170_v47 = vadd.f32 %v169_v45, %v35_v26  ;;  %v147_v48 = vpop.f32.mrb[5].mxu0  ;;  %v171_v49 = vpop.f32.mrb[5].mxu1 }
  0xe9   :  { %v148_v50 = vadd.f32 %v147_v48, %v39_v27  ;;  %v172_v51 = vadd.f32 %v171_v49, %v39_v27 }
  0xea   :  { %185 = vst [vmem:[%s361_s3 + $0x20] sm:$0xff] %v146_v46  ;;  %193 = vst [vmem:[%s361_s3 + $0x60] sm:$0xff] %v170_v47 }
  0xeb   :  { %186 = vst.msk [vmem:[%s361_s3 + $0x28] sm:$0xff] %vm181_vm1, %v148_v50  ;;  %194 = vst.msk [vmem:[%s361_s3 + $0x68] sm:$0xff] %vm181_vm1, %v172_v51  ;;  %v151_v52 = vpop.f32.mrb[6].mxu0  ;;  %v175_v53 = vpop.f32.mrb[6].mxu1 }
  0xec   :  { %v152_v54 = vadd.f32 %v151_v52, %v35_v26  ;;  %v176_v55 = vadd.f32 %v175_v53, %v35_v26  ;;  %v153_v56 = vpop.f32.mrb[7].mxu0  ;;  %v177_v57 = vpop.f32.mrb[7].mxu1 }
  0xed   :  { %v154_v58 = vadd.f32 %v153_v56, %v39_v27  ;;  %v178_v59 = vadd.f32 %v177_v57, %v39_v27 }
  0xee   :  { %187 = vst [vmem:[%s361_s3 + $0x30] sm:$0xff] %v152_v54  ;;  %195 = vst [vmem:[%s361_s3 + $0x70] sm:$0xff] %v176_v55 }
  0xef   :  { %188 = vst.msk [vmem:[%s361_s3 + $0x38] sm:$0xff] %vm181_vm1, %v154_v58  ;;  %196 = vst.msk [vmem:[%s361_s3 + $0x78] sm:$0xff] %vm181_vm1, %v178_v59 }

// kernel: s2s_forward.8
= control target key start
LH: loop header
LB: loop body
LE: loop exit
PB: predicated region body
PF: predicated region fallthrough
CT: control target
= control target key end

     0   :  { %s817_s24 = smov 0   ;;  %s962_s0 = inlined_call_operand.vmem [shape: f32[8,8,192], index: 0, kind: input, shape index: {}]   ;;  %s963_s1 = inlined_call_operand.vmem [shape: f32[8,8,192], index: 1, kind: input, shape index: {}]   ;;  %s964_s2 = inlined_call_operand.vmem [shape: f32[64,192], index: 2, kind: input, shape index: {}]   ;;  %s965_s3 = inlined_call_operand.vmem [shape: f32[1,192], index: 3, kind: input, shape index: {}]   ;;  %s966_s4 = inlined_call_operand.vmem [shape: f32[64,192], index: 4, kind: input, shape index: {}]   ;;  %s967_s5 = inlined_call_operand.vmem [shape: f32[1,192], index: 5, kind: input, shape index: {}]   ;;  %s968_s6 = inlined_call_operand.vmem [shape: f32[8,8,64], index: 6, kind: output, shape index: {0}]   ;;  %s969_s7 = inlined_call_operand.vmem [shape: f32[8,8,64], index: 7, kind: output, shape index: {1}]  }
   0x1 LB: > { %s691_s25 = sadd.s32 4294967295, %s772_s24   ;;  %p695_p0 = scmp.ge.s32.totalorder %s772_s24, 1  ;;  %s772_s24 = sphi %s817_s24, %s18_s24  }
   0x2   : > { %p256_p1 = scmp.lt.s32.totalorder %s772_s24, 9 }
   0x4   : > { %p257_p2 = pnand %p695_p0, %p256_p1 }
   0x5   : > { %p298_p3 = scmp.lt.s32.totalorder (!%p257_p2), %s691_s25, 7  ;;  %s303_s26 = ssub.s32 (!%p257_p2), 7, %s691_s25 }
   0x6   : > { %260 = sbr.rel (%p257_p2) target bundleno = 537 (0x219), region = 44  ;;  %p304_p4 = scmp.lt.s32.totalorder (!%p257_p2), %s303_s26, 7 }
   0x7   : > { %p702_p5 = scmp.ne.s32.totalorder (!%p257_p2), %s691_s25, 0 }
   0xd   : > { %s299_s27 = scalar_select %p298_p3, %s691_s25, 7 }
   0xe   : > { %s971_s26 = smov (!%p304_p4, %s303_s26), 7  ;;  %323 = sbr.rel (%p702_p5) target bundleno = 21 (0x15), region = 48 }
   0xf   : > { %s709_s28 = sshll.u32 %s299_s27, 4  ;;  %s700_s29 = sshll.u32 %s299_s27, 3  ;;  %vm324_vm0 = vcmask (!%p702_p5), 523264   ;;  %v774_v0 = vmov (!%p702_p5), 0.0  }
  0x10   : > { %s828_s9 = scalar_lea.vmem %s962_s0, %s709_s28  ;;  %s710_s10 = sshll.u32 %s971_s26, 4  ;;  %325 = vst.msk [vmem:[#allocation2] sm:$0xff] (!%p702_p5), %vm324_vm0, %v774_v0  ;;  %326 = vst.msk [vmem:[#allocation3] sm:$0xff] (!%p702_p5), %vm324_vm0, %v774_v0 }
  0x11   : > { %s833_s13 = scalar_lea.vmem %s963_s1, %s710_s10  ;;  %s838_s16 = scalar_lea.vmem %s968_s6, %s700_s29 }
  0x12   : > { %s701_s17 = sshll.u32 %s971_s26, 3 }
  0x13   : > { %s843_s20 = scalar_lea.vmem %s969_s7, %s701_s17 }
  0x15 PF: > { %v329_v1 = vld [vmem:[%s964_s2 + $0x8] sm:$0xff]  ;;  %v331_v2 = vld [vmem:[%s964_s2 + $0x18] sm:$0xff]  ;;  %v328_v6 = vld [vmem:[%s964_s2] sm:$0xff]  ;;  %v775_v8 = vmov 0.0   ;;  %vm356_vm1 = vcmask 523264   ;;  %v346_v52 = vlaneseq  ;;  %s776_s15 = smov 64  }
  0x16   : > { %v462_v3 = vld [vmem:[%s966_s4 + $0x8] sm:$0xff]  ;;  %v711_v4 = vpack.c.bf16 %v331_v2, %v329_v1  ;;  %v464_v5 = vld [vmem:[%s966_s4 + $0x18] sm:$0xff]  ;;  %v330_v7 = vld [vmem:[%s964_s2 + $0x10] sm:$0xff]  ;;  %424 = vmatprep.mubr.f32.mxu0 %v775_v8  ;;  %556 = vmatprep.mubr.f32.mxu1 %v775_v8 }
  0x17   : > { %v727_v9 = vpack.c.bf16 %v464_v5, %v462_v3  ;;  %v713_v10 = vpack.c.bf16 %v330_v7, %v328_v6  ;;  %v461_v11 = vld [vmem:[%s966_s4] sm:$0xff]  ;;  %v463_v12 = vld [vmem:[%s966_s4 + $0x10] sm:$0xff]  ;;  %v333_v13 = vld [vmem:[%s964_s2 + $0x28] sm:$0xff]  ;;  %v347_v53 = vshrl.u32 %v346_v52, 7 }
  0x18   : > { %712 = vmatprep.subr.bf16.mxu0 %v711_v4  ;;  %v729_v14 = vpack.c.bf16 %v463_v12, %v461_v11  ;;  %v335_v15 = vld [vmem:[%s964_s2 + $0x38] sm:$0xff]  ;;  %v466_v16 = vld [vmem:[%s966_s4 + $0x28] sm:$0xff]  ;;  %v332_v20 = vld [vmem:[%s964_s2 + $0x20] sm:$0xff] }
  0x19   : > { %v468_v17 = vld [vmem:[%s966_s4 + $0x38] sm:$0xff]  ;;  %728 = vmatprep.subr.bf16.mxu1 %v727_v9  ;;  %714 = vmatpush1.bf16.msra.mxu0 %v713_v10  ;;  %v715_v18 = vpack.c.bf16 %v335_v15, %v333_v13  ;;  %v334_v21 = vld [vmem:[%s964_s2 + $0x30] sm:$0xff]  ;;  %v465_v22 = vld [vmem:[%s966_s4 + $0x20] sm:$0xff]  ;;  %v348_v54 = vsub.s32 0, %v347_v53  ;;  %v352_v11 = vsub.s32 1, %v347_v53 }
  0x1a   : > { %v731_v19 = vpack.c.bf16 %v468_v17, %v466_v16  ;;  %730 = vmatpush1.bf16.msra.mxu1 %v729_v14  ;;  %v717_v23 = vpack.c.bf16 %v334_v21, %v332_v20  ;;  %v467_v24 = vld [vmem:[%s966_s4 + $0x30] sm:$0xff]  ;;  %v337_v25 = vld [vmem:[%s964_s2 + $0x48] sm:$0xff]  ;;  %v339_v26 = vld [vmem:[%s964_s2 + $0x58] sm:$0xff] }
  0x1b   : > { %716 = vmatprep.subr.bf16.mxu0 %v715_v18  ;;  %v733_v27 = vpack.c.bf16 %v467_v24, %v465_v22  ;;  %v719_v28 = vpack.c.bf16 %v339_v26, %v337_v25  ;;  %v470_v29 = vld [vmem:[%s966_s4 + $0x48] sm:$0xff]  ;;  %v472_v30 = vld [vmem:[%s966_s4 + $0x58] sm:$0xff]  ;;  %v336_v31 = vld [vmem:[%s964_s2 + $0x40] sm:$0xff] }
  0x1c   : > { %732 = vmatprep.subr.bf16.mxu1 %v731_v19  ;;  %v735_v32 = vpack.c.bf16 %v472_v30, %v470_v29  ;;  %v338_v33 = vld [vmem:[%s964_s2 + $0x50] sm:$0xff]  ;;  %v469_v34 = vld [vmem:[%s966_s4 + $0x40] sm:$0xff]  ;;  %v341_v37 = vld [vmem:[%s964_s2 + $0x68] sm:$0xff] }
  0x1d   : > { %v471_v35 = vld [vmem:[%s966_s4 + $0x50] sm:$0xff]  ;;  %718 = vmatpush1.bf16.msra.mxu0 %v717_v23  ;;  %v721_v36 = vpack.c.bf16 %v338_v33, %v336_v31  ;;  %v343_v38 = vld [vmem:[%s964_s2 + $0x78] sm:$0xff]  ;;  %v474_v39 = vld [vmem:[%s966_s4 + $0x68] sm:$0xff] }
  0x1e   : > { %734 = vmatpush1.bf16.msra.mxu1 %v733_v27  ;;  %720 = vmatprep.subr.bf16.mxu0 %v719_v28  ;;  %v737_v40 = vpack.c.bf16 %v471_v35, %v469_v34  ;;  %v723_v41 = vpack.c.bf16 %v343_v38, %v341_v37  ;;  %v476_v42 = vld [vmem:[%s966_s4 + $0x78] sm:$0xff]  ;;  %v340_v43 = vld [vmem:[%s964_s2 + $0x60] sm:$0xff]  ;;  %v342_v44 = vld [vmem:[%s964_s2 + $0x70] sm:$0xff] }
  0x1f   : > { %736 = vmatprep.subr.bf16.mxu1 %v735_v32  ;;  %v739_v45 = vpack.c.bf16 %v476_v42, %v474_v39  ;;  %v473_v46 = vld [vmem:[%s966_s4 + $0x60] sm:$0xff]  ;;  %v475_v47 = vld [vmem:[%s966_s4 + $0x70] sm:$0xff]  ;;  %v725_v48 = vpack.c.bf16 %v342_v44, %v340_v43  ;;  %v460_v51 = vld [vmem:[#allocation3] sm:$0xff] }
  0x20   : > { %v741_v49 = vpack.c.bf16 %v475_v47, %v473_v46  ;;  %v327_v50 = vld [vmem:[#allocation2] sm:$0xff]  ;;  %v432_v16 = vld [vmem:[%s828_s9 + $0x8] sm:$0xff] }
  0x21   : > { %722 = vmatpush1.bf16.msra.mxu0 %v721_v36  ;;  %v344_v55 = vld [vmem:[%s965_s3] sm:$0x3]  ;;  %v564_v20 = vld [vmem:[%s833_s13 + $0x8] sm:$0xff] }
  0x22   : > { %738 = vmatpush1.bf16.msra.mxu1 %v737_v40  ;;  %724 = vmatprep.subr.bf16.mxu0 %v723_v41  ;;  %v477_v56 = vld [vmem:[%s967_s5] sm:$0x3]  ;;  %v349_v57 = vrot.slane %v344_v55, %v348_v54  ;;  %v353_v12 = vrot.slane %v344_v55, %v352_v11 }
  0x23   : > { %740 = vmatprep.subr.bf16.mxu1 %v739_v45  ;;  %v482_v58 = vrot.slane %v477_v56, %v348_v54  ;;  %v431_v60 = vld [vmem:[%s828_s9] sm:$0xff]  ;;  %v486_v13 = vrot.slane %v477_v56, %v352_v11 }
  0x24   : > { %v563_v63 = vld [vmem:[%s833_s13] sm:$0xff] }
  0x25   : > { %726 = vmatpush1.bf16.msra.mxu0 %v725_v48 }
  0x26   : > { %742 = vmatpush1.bf16.msra.mxu1 %v741_v49 }
  0x28   : > { %703 = vmatmul.mubr.msk.f32.vlgmr.msra.gmra.mrb[0].mxu0 %vm356_vm1, %v327_v50 }
  0x29   : > { %705 = vmatmul.mubr.msk.f32.vlgmr.msra.gmra.mrb[0].mxu1 %vm356_vm1, %v460_v51 }
  0xfb   : > { %v426_v59 = vpop.f32.mrb[0].mxu0 }
  0xfc   : > { %v427_v61 = vadd.f32 %v426_v59, %v349_v57  ;;  %v558_v62 = vpop.f32.mrb[0].mxu1  ;;  %v428_v0 = vpop.f32.mrb[1].mxu0 }
  0xfd   : > { %v559_v1 = vadd.f32 %v558_v62, %v482_v58  ;;  %v560_v2 = vpop.f32.mrb[1].mxu1  ;;  %v429_v14 = vadd.f32 %v428_v0, %v353_v12 }
  0xfe   : > { %v433_v3 = vadd.f32 %v431_v60, %v427_v61  ;;  %v561_v17 = vadd.f32 %v560_v2, %v486_v13 }
  0xff   : > { %v565_v4 = vadd.f32 %v563_v63, %v559_v1 }
 0x100   : > { %v704_v5 = vmul.f32 -1.442695, %v433_v3 }
 0x101   : > { %v706_v6 = vmul.f32 -1.442695, %v565_v4 }
 0x102   : > { %754 = vpow2.f32 %v704_v5 }
 0x103   : > { %756 = vpow2.f32 %v706_v6 }
 0x10c   : > { %v755_v7 = vpop.eup %754 }
 0x10d   : > { %v757_v8 = vpop.eup %756  ;;  %v437_v9 = vadd.f32 1.0, %v755_v7 }
 0x10e   : > { %v569_v10 = vadd.f32 1.0, %v757_v8 }
 0x10f   : > { %758 = vrcp.f32 %v437_v9 }
 0x110   : > { %760 = vrcp.f32 %v569_v10 }
 0x119   : > { %v759_v15 = vpop.eup %758 }
 0x11a   : > { %v761_v18 = vpop.eup %760  ;;  %v440_v19 = vmul.f32 %v759_v15, %v429_v14  ;;  %v443_v28 = vsub.f32 1.0, %v759_v15 }
 0x11b   : > { %v572_v21 = vmul.f32 %v761_v18, %v561_v17  ;;  %v575_v29 = vsub.f32 1.0, %v761_v18 }
 0x11c   : > { %v441_v22 = vadd.f32 %v440_v19, %v432_v16 }
 0x11d   : > { %v573_v23 = vadd.f32 %v572_v21, %v564_v20 }
 0x11e   : > { %762 = vtanh.f32 %v441_v22 }
 0x11f   : > { %764 = vtanh.f32 %v573_v23 }
 0x128   : > { %v763_v24 = vpop.eup %762 }
 0x129   : > { %v765_v25 = vpop.eup %764  ;;  %445 = vrot.lane.b32.xlu0 %v763_v24, %s776_s15 }
 0x12a   : > { %577 = vrot.lane.b32.xlu1 %v765_v25, %s776_s15 }
 0x12d   : > { %449 = vrot.lane.b32.xlu0 %v327_v50, %s776_s15 }
 0x12e   : > { %581 = vrot.lane.b32.xlu1 %v460_v51, %s776_s15 }
 0x19b   : > { %v446_v26 = vpop.permute.xlu0 %445 }
 0x19c   : > { %v578_v27 = vpop.permute.xlu1 %577  ;;  %v448_v31 = vmul.f32 %v446_v26, %v443_v28 }
 0x19d   : > { %v580_v34 = vmul.f32 %v578_v27, %v575_v29 }
 0x19f   : > { %v450_v30 = vpop.permute.xlu0 %449 }
 0x1a0   : > { %v582_v32 = vpop.permute.xlu1 %581  ;;  %v452_v33 = vmul.f32 %v759_v15, %v450_v30 }
 0x1a1   : > { %v584_v35 = vmul.f32 %v761_v18, %v582_v32 }
 0x1a2   : > { %v453_v36 = vadd.f32 %v452_v33, %v448_v31 }
 0x1a3   : > { %v585_v37 = vadd.f32 %v584_v35, %v580_v34 }
 0x1a4   : > { %455 = vrot.lane.b32.xlu0 %v453_v36, %s776_s15 }
 0x1a5   : > { %587 = vrot.lane.b32.xlu1 %v585_v37, %s776_s15 }
 0x216   : > { %v456_v38 = vpop.permute.xlu0 %455 }
 0x217   : > { %v588_v39 = vpop.permute.xlu1 %587  ;;  %458 = vst.msk [vmem:[#allocation2] sm:$0xff] %vm356_vm1, %v456_v38  ;;  %459 = vst.msk [vmem:[%s838_s16] sm:$0xff] %vm356_vm1, %v456_v38 }
 0x218   : > { %590 = vst.msk [vmem:[#allocation3] sm:$0xff] %vm356_vm1, %v588_v39  ;;  %591 = vst.msk [vmem:[%s843_s20] sm:$0xff] %vm356_vm1, %v588_v39 }
 0x219 PF: > { %s18_s24 = sadd.s32 1, %s772_s24  }
 0x21a   : > { %p15_p6 = scmp.ge.s32.totalorder %s18_s24, 10  }
 0x21c   :  { %17 = sbr.rel (!%p15_p6) target bundleno = 1 (0x1), region = 93 }

// kernel: s2s_forward.9
= control target key start
LH: loop header
LB: loop body
LE: loop exit
PB: predicated region body
PF: predicated region fallthrough
CT: control target
= control target key end

     0   :  { %v375_v2 = vmov 0.0|0.0   ;;  %v376_v4 = vmov 0.0   ;;  %vm377_vm0 = vmmov 0   ;;  %vm50_vm1 = vcmask 261120   ;;  %s569_s1 = inlined_call_operand.vmem [shape: f32[32,384], index: 1, kind: input, shape index: {}]   ;;  %s570_s0 = inlined_call_operand.vmem [shape: f32[56,32], index: 0, kind: input, shape index: {}]   ;;  %s571_s2 = inlined_call_operand.vmem [shape: f32[1,384], index: 2, kind: input, shape index: {}]   ;;  %s572_s3 = inlined_call_operand.vmem [shape: f32[56,384], index: 3, kind: output, shape index: {}]  }
   0x1   :  { %v22_v0 = vld [vmem:[%s569_s1 + $0x8] sm:$0xff]  ;;  %v25_v1 = vld [vmem:[%s569_s1 + $0x20] sm:$0xff]  ;;  %366 = vmatprep.subr.bf16.mxu1 %v375_v2  ;;  %136 = vmatprep.mubr.f32.mxu0 %v376_v4  ;;  %v24_v6 = vld [vmem:[%s569_s1 + $0x18] sm:$0xff]  ;;  %v35_v27 = vlaneseq }
   0x2   :  { %v21_v3 = vld [vmem:[%s569_s1] sm:$0xff]  ;;  %v358_v5 = vpack.c.bf16 %v25_v1, %v22_v0  ;;  %v23_v7 = vld [vmem:[%s569_s1 + $0x10] sm:$0xff]  ;;  %v26_v8 = vld [vmem:[%s569_s1 + $0x28] sm:$0xff]  ;;  %337 = vmatprep.mubr.msk.f32.mxu1 %vm377_vm0, %v376_v4 }
   0x3   :  { %v360_v9 = vpack.c.bf16 %v24_v6, %v21_v3  ;;  %v367_v10 = vpack.c.bf16 %v26_v8, %v23_v7  ;;  %v28_v11 = vld [vmem:[%s569_s1 + $0x38] sm:$0xff]  ;;  %v31_v12 = vld [vmem:[%s569_s1 + $0x50] sm:$0xff]  ;;  %v30_v15 = vld [vmem:[%s569_s1 + $0x48] sm:$0xff]  ;;  %v36_v28 = vshrl.u32 %v35_v27, 7 }
   0x4   :  { %v27_v13 = vld [vmem:[%s569_s1 + $0x30] sm:$0xff]  ;;  %359 = vmatprep.subr.bf16.mxu0 %v358_v5  ;;  %v362_v14 = vpack.c.bf16 %v31_v12, %v28_v11  ;;  %v29_v16 = vld [vmem:[%s569_s1 + $0x40] sm:$0xff]  ;;  %v32_v17 = vld [vmem:[%s569_s1 + $0x58] sm:$0xff] }
   0x5   :  { %361 = vmatpush1.bf16.msra.mxu0 %v360_v9  ;;  %368 = vmatpush3.bf16.msra.mxu1 %v367_v10  ;;  %v364_v18 = vpack.c.bf16 %v30_v15, %v27_v13  ;;  %v370_v19 = vpack.c.bf16 %v32_v17, %v29_v16  ;;  %v14_v20 = vld [vmem:[%s570_s0] sm:$0xff]  ;;  %v15_v21 = vld [vmem:[%s570_s0 + $0x8] sm:$0xff]  ;;  %v16_v22 = vld [vmem:[%s570_s0 + $0x10] sm:$0xff]  ;;  %v37_v29 = vsub.s32 0, %v36_v28  ;;  %v45_v30 = vsub.s32 2, %v36_v28 }
   0x6   :  { %363 = vmatprep.subr.bf16.mxu0 %v362_v14  ;;  %369 = vmatprep.subr.bf16.mxu1 %v375_v2  ;;  %v17_v23 = vld [vmem:[%s570_s0 + $0x18] sm:$0xff]  ;;  %v18_v24 = vld [vmem:[%s570_s0 + $0x20] sm:$0xff]  ;;  %v19_v25 = vld [vmem:[%s570_s0 + $0x28] sm:$0xff]  ;;  %v41_v32 = vsub.s32 1, %v36_v28 }
   0x7   :  { %v20_v26 = vld [vmem:[%s570_s0 + $0x30] sm:$0xff]  ;;  %v33_v31 = vld [vmem:[%s571_s2] sm:$0x7] }
   0x8   :  { %v479_v33 = vrot.slane %v33_v31, %v37_v29  ;;  %v481_v34 = vrot.slane %v33_v31, %v45_v30  ;;  %v483_v35 = vrot.slane %v33_v31, %v41_v32 }
   0x9   :  { %365 = vmatpush1.bf16.msra.mxu0 %v364_v18  ;;  %371 = vmatpush3.bf16.msra.mxu1 %v370_v19 }
   0xc   :  { %304 = vmatmul.mubr.msk.f32.vlgmr.msra.gmra.mrb[0].mxu0 %vm50_vm1, %v14_v20  ;;  %338 = vmatmul.mubr.msk.f32.vlgmr.msra.gmra.mrb[0].mxu1 %vm50_vm1, %v14_v20 }
   0xd   :  { %142 = vmatprep.mubr.f32.mxu0 %v376_v4  ;;  %340 = vmatprep.mubr.msk.f32.mxu1 %vm377_vm0, %v376_v4 }
  0x10   :  { %305 = vmatmul.mubr.msk.f32.gmra.mrb[2].mxu0 %vm50_vm1, %v15_v21  ;;  %341 = vmatmul.mubr.msk.f32.gmra.mrb[2].mxu1 %vm50_vm1, %v15_v21 }
  0x11   :  { %148 = vmatprep.mubr.f32.mxu0 %v376_v4  ;;  %343 = vmatprep.mubr.msk.f32.mxu1 %vm377_vm0, %v376_v4 }
  0x14   :  { %306 = vmatmul.mubr.msk.f32.gmra.mrb[4].mxu0 %vm50_vm1, %v16_v22  ;;  %344 = vmatmul.mubr.msk.f32.gmra.mrb[4].mxu1 %vm50_vm1, %v16_v22 }
  0x15   :  { %154 = vmatprep.mubr.f32.mxu0 %v376_v4  ;;  %346 = vmatprep.mubr.msk.f32.mxu1 %vm377_vm0, %v376_v4 }
  0x18   :  { %307 = vmatmul.mubr.msk.f32.gmra.mrb[6].mxu0 %vm50_vm1, %v17_v23  ;;  %347 = vmatmul.mubr.msk.f32.gmra.mrb[6].mxu1 %vm50_vm1, %v17_v23 }
  0x19   :  { %160 = vmatprep.mubr.f32.mxu0 %v376_v4  ;;  %349 = vmatprep.mubr.msk.f32.mxu1 %vm377_vm0, %v376_v4 }
  0x1c   :  { %308 = vmatmul.mubr.msk.f32.gmra.mrb[8].mxu0 %vm50_vm1, %v18_v24  ;;  %350 = vmatmul.mubr.msk.f32.gmra.mrb[8].mxu1 %vm50_vm1, %v18_v24 }
  0x1d   :  { %166 = vmatprep.mubr.f32.mxu0 %v376_v4  ;;  %352 = vmatprep.mubr.msk.f32.mxu1 %vm377_vm0, %v376_v4 }
  0x20   :  { %309 = vmatmul.mubr.msk.f32.gmra.mrb[10].mxu0 %vm50_vm1, %v19_v25  ;;  %353 = vmatmul.mubr.msk.f32.gmra.mrb[10].mxu1 %vm50_vm1, %v19_v25 }
  0x21   :  { %172 = vmatprep.mubr.f32.mxu0 %v376_v4  ;;  %355 = vmatprep.mubr.msk.f32.mxu1 %vm377_vm0, %v376_v4 }
  0x24   :  { %310 = vmatmul.mubr.msk.f32.gmra.mrb[12].mxu0 %vm50_vm1, %v20_v26  ;;  %356 = vmatmul.mubr.msk.f32.gmra.mrb[12].mxu1 %vm50_vm1, %v20_v26 }
  0xdf   :  { %v138_v36 = vpop.f32.mrb[0].mxu0  ;;  %v245_v37 = vpop.f32.mrb[0].mxu1 }
  0xe0   :  { %v139_v38 = vadd.f32 %v138_v36, %v479_v33  ;;  %v246_v39 = vadd.f32 %v245_v37, %v481_v34  ;;  %v140_v40 = vpop.f32.mrb[1].mxu0  ;;  %v339_v41 = vpop.f32.mrb[1].mxu1 }
  0xe1   :  { %v141_v42 = vadd.f32 %v140_v40, %v483_v35 }
  0xe2   :  { %279 = vst [vmem:[%s572_s3] sm:$0xff] %v139_v38  ;;  %281 = vst [vmem:[%s572_s3 + $0x10] sm:$0xff] %v246_v39 }
  0xe3   :  { %280 = vst [vmem:[%s572_s3 + $0x8] sm:$0xff] %v141_v42  ;;  %v144_v43 = vpop.f32.mrb[2].mxu0  ;;  %v250_v44 = vpop.f32.mrb[2].mxu1 }
  0xe4   :  { %v145_v45 = vadd.f32 %v144_v43, %v479_v33  ;;  %v251_v46 = vadd.f32 %v250_v44, %v481_v34  ;;  %v146_v47 = vpop.f32.mrb[3].mxu0  ;;  %v342_v48 = vpop.f32.mrb[3].mxu1 }
  0xe5   :  { %v147_v49 = vadd.f32 %v146_v47, %v483_v35 }
  0xe6   :  { %282 = vst [vmem:[%s572_s3 + $0x18] sm:$0xff] %v145_v45  ;;  %284 = vst [vmem:[%s572_s3 + $0x28] sm:$0xff] %v251_v46 }
  0xe7   :  { %283 = vst [vmem:[%s572_s3 + $0x20] sm:$0xff] %v147_v49  ;;  %v150_v50 = vpop.f32.mrb[4].mxu0  ;;  %v255_v51 = vpop.f32.mrb[4].mxu1 }
  0xe8   :  { %v151_v52 = vadd.f32 %v150_v50, %v479_v33  ;;  %v256_v53 = vadd.f32 %v255_v51, %v481_v34  ;;  %v152_v54 = vpop.f32.mrb[5].mxu0  ;;  %v345_v55 = vpop.f32.mrb[5].mxu1 }
  0xe9   :  { %v153_v56 = vadd.f32 %v152_v54, %v483_v35 }
  0xea   :  { %285 = vst [vmem:[%s572_s3 + $0x30] sm:$0xff] %v151_v52  ;;  %287 = vst [vmem:[%s572_s3 + $0x40] sm:$0xff] %v256_v53 }
  0xeb   :  { %286 = vst [vmem:[%s572_s3 + $0x38] sm:$0xff] %v153_v56  ;;  %v156_v57 = vpop.f32.mrb[6].mxu0  ;;  %v260_v58 = vpop.f32.mrb[6].mxu1 }
  0xec   :  { %v157_v59 = vadd.f32 %v156_v57, %v479_v33  ;;  %v261_v60 = vadd.f32 %v260_v58, %v481_v34  ;;  %v158_v61 = vpop.f32.mrb[7].mxu0  ;;  %v348_v62 = vpop.f32.mrb[7].mxu1 }
  0xed   :  { %v159_v63 = vadd.f32 %v158_v61, %v483_v35 }
  0xee   :  { %288 = vst [vmem:[%s572_s3 + $0x48] sm:$0xff] %v157_v59  ;;  %290 = vst [vmem:[%s572_s3 + $0x58] sm:$0xff] %v261_v60 }
  0xef   :  { %289 = vst [vmem:[%s572_s3 + $0x50] sm:$0xff] %v159_v63  ;;  %v162_v0 = vpop.f32.mrb[8].mxu0  ;;  %v265_v1 = vpop.f32.mrb[8].mxu1 }
  0xf0   :  { %v163_v2 = vadd.f32 %v162_v0, %v479_v33  ;;  %v266_v3 = vadd.f32 %v265_v1, %v481_v34  ;;  %v164_v4 = vpop.f32.mrb[9].mxu0  ;;  %v351_v5 = vpop.f32.mrb[9].mxu1 }
  0xf1   :  { %v165_v6 = vadd.f32 %v164_v4, %v483_v35 }
  0xf2   :  { %291 = vst [vmem:[%s572_s3 + $0x60] sm:$0xff] %v163_v2  ;;  %293 = vst [vmem:[%s572_s3 + $0x70] sm:$0xff] %v266_v3 }
  0xf3   :  { %292 = vst [vmem:[%s572_s3 + $0x68] sm:$0xff] %v165_v6  ;;  %v168_v7 = vpop.f32.mrb[10].mxu0  ;;  %v270_v8 = vpop.f32.mrb[10].mxu1 }
  0xf4   :  { %v169_v9 = vadd.f32 %v168_v7, %v479_v33  ;;  %v271_v10 = vadd.f32 %v270_v8, %v481_v34  ;;  %v170_v11 = vpop.f32.mrb[11].mxu0  ;;  %v354_v12 = vpop.f32.mrb[11].mxu1 }
  0xf5   :  { %v171_v13 = vadd.f32 %v170_v11, %v483_v35 }
  0xf6   :  { %294 = vst [vmem:[%s572_s3 + $0x78] sm:$0xff] %v169_v9  ;;  %296 = vst [vmem:[%s572_s3 + $0x88] sm:$0xff] %v271_v10 }
  0xf7   :  { %295 = vst [vmem:[%s572_s3 + $0x80] sm:$0xff] %v171_v13  ;;  %v174_v14 = vpop.f32.mrb[12].mxu0  ;;  %v275_v15 = vpop.f32.mrb[12].mxu1 }
  0xf8   :  { %v175_v16 = vadd.f32 %v174_v14, %v479_v33  ;;  %v276_v17 = vadd.f32 %v275_v15, %v481_v34  ;;  %v176_v18 = vpop.f32.mrb[13].mxu0  ;;  %v357_v19 = vpop.f32.mrb[13].mxu1 }
  0xf9   :  { %v177_v20 = vadd.f32 %v176_v18, %v483_v35 }
  0xfa   :  { %297 = vst [vmem:[%s572_s3 + $0x90] sm:$0xff] %v175_v16  ;;  %299 = vst [vmem:[%s572_s3 + $0xa0] sm:$0xff] %v276_v17 }
  0xfb   :  { %298 = vst [vmem:[%s572_s3 + $0x98] sm:$0xff] %v177_v20 }

// kernel: s2s_forward.11
= control target key start
LH: loop header
LB: loop body
LE: loop exit
PB: predicated region body
PF: predicated region fallthrough
CT: control target
= control target key end

     0   :  { %v535_v3 = vmov 0.0|0.0   ;;  %vm536_vm0 = vmmov 0   ;;  %v537_v11 = vmov 0.0   ;;  %s768_s0 = inlined_call_operand.vmem [shape: f32[56,128], index: 0, kind: input, shape index: {}]   ;;  %s769_s1 = inlined_call_operand.vmem [shape: f32[56,128], index: 1, kind: input, shape index: {}]   ;;  %s770_s2 = inlined_call_operand.vmem [shape: f32[128,128], index: 2, kind: input, shape index: {}]   ;;  %s771_s3 = inlined_call_operand.vmem [shape: f32[128,128], index: 3, kind: input, shape index: {}]   ;;  %s772_s4 = inlined_call_operand.vmem [shape: f32[1,128], index: 4, kind: input, shape index: {}]   ;;  %s773_s5 = inlined_call_operand.hbm [shape: f32[56,128], index: 5, kind: output, shape index: {}]  }
   0x1   :  { %v51_v0 = vld [vmem:[%s771_s3] sm:$0xff]  ;;  %v52_v1 = vld [vmem:[%s771_s3 + $0x8] sm:$0xff]  ;;  %457 = vmatprep.subr.bf16.mxu0 %v535_v3  ;;  %481 = vmatprep.subr.bf16.mxu1 %v535_v3  ;;  %v53_v6 = vld [vmem:[%s771_s3 + $0x10] sm:$0xff] }
   0x2   :  { %v28_v2 = vld [vmem:[%s770_s2] sm:$0xff]  ;;  %v458_v4 = vpack.c.bf16 %v52_v1, %v51_v0  ;;  %v29_v5 = vld [vmem:[%s770_s2 + $0x8] sm:$0xff]  ;;  %v54_v7 = vld [vmem:[%s771_s3 + $0x18] sm:$0xff]  ;;  %383 = vmatprep.mubr.msk.f32.mxu0 %vm536_vm0, %v537_v11  ;;  %436 = vmatprep.mubr.msk.f32.mxu1 %vm536_vm0, %v537_v11 }
   0x3   :  { %v482_v8 = vpack.c.bf16 %v29_v5, %v28_v2  ;;  %v30_v9 = vld [vmem:[%s770_s2 + $0x10] sm:$0xff]  ;;  %v31_v10 = vld [vmem:[%s770_s2 + $0x18] sm:$0xff]  ;;  %v461_v12 = vpack.c.bf16 %v54_v7, %v53_v6  ;;  %v55_v14 = vld [vmem:[%s771_s3 + $0x20] sm:$0xff] }
   0x4   :  { %459 = vmatpush3.bf16.msra.mxu0 %v458_v4  ;;  %v485_v13 = vpack.c.bf16 %v31_v10, %v30_v9  ;;  %v56_v15 = vld [vmem:[%s771_s3 + $0x28] sm:$0xff]  ;;  %v32_v16 = vld [vmem:[%s770_s2 + $0x20] sm:$0xff]  ;;  %v57_v20 = vld [vmem:[%s771_s3 + $0x30] sm:$0xff] }
   0x5   :  { %483 = vmatpush3.bf16.msra.mxu1 %v482_v8  ;;  %460 = vmatprep.subr.bf16.mxu0 %v535_v3  ;;  %v33_v17 = vld [vmem:[%s770_s2 + $0x28] sm:$0xff]  ;;  %v464_v18 = vpack.c.bf16 %v56_v15, %v55_v14  ;;  %v58_v21 = vld [vmem:[%s771_s3 + $0x38] sm:$0xff]  ;;  %v34_v22 = vld [vmem:[%s770_s2 + $0x30] sm:$0xff] }
   0x6   :  { %484 = vmatprep.subr.bf16.mxu1 %v535_v3  ;;  %v488_v19 = vpack.c.bf16 %v33_v17, %v32_v16  ;;  %v35_v23 = vld [vmem:[%s770_s2 + $0x38] sm:$0xff]  ;;  %v467_v24 = vpack.c.bf16 %v58_v21, %v57_v20  ;;  %v59_v26 = vld [vmem:[%s771_s3 + $0x40] sm:$0xff]  ;;  %v60_v27 = vld [vmem:[%s771_s3 + $0x48] sm:$0xff] }
   0x7   :  { %v491_v25 = vpack.c.bf16 %v35_v23, %v34_v22  ;;  %v36_v28 = vld [vmem:[%s770_s2 + $0x40] sm:$0xff]  ;;  %v37_v29 = vld [vmem:[%s770_s2 + $0x48] sm:$0xff]  ;;  %v470_v30 = vpack.c.bf16 %v60_v27, %v59_v26 }
   0x8   :  { %462 = vmatpush3.bf16.msra.mxu0 %v461_v12 }
   0x9   :  { %486 = vmatpush3.bf16.msra.mxu1 %v485_v13  ;;  %463 = vmatprep.subr.bf16.mxu0 %v535_v3 }
   0xa   :  { %487 = vmatprep.subr.bf16.mxu1 %v535_v3 }
   0xc   :  { %465 = vmatpush3.bf16.msra.mxu0 %v464_v18 }
   0xd   :  { %489 = vmatpush3.bf16.msra.mxu1 %v488_v19  ;;  %466 = vmatprep.subr.bf16.mxu0 %v535_v3 }
   0xe   :  { %490 = vmatprep.subr.bf16.mxu1 %v535_v3 }
  0x10   :  { %468 = vmatpush3.bf16.msra.mxu0 %v467_v24 }
  0x11   :  { %10 = vsyncpa [#allocation3], 0  ;;  %492 = vmatpush3.bf16.msra.mxu1 %v491_v25  ;;  %469 = vmatprep.subr.bf16.mxu0 %v535_v3  ;;  %v494_v31 = vpack.c.bf16 %v37_v29, %v36_v28  ;;  %v61_v32 = vld [vmem:[%s771_s3 + $0x50] sm:$0xff]  ;;  %v62_v33 = vld [vmem:[%s771_s3 + $0x58] sm:$0xff] }
  0x12   :  { %493 = vmatprep.subr.bf16.mxu1 %v535_v3  ;;  %v38_v34 = vld [vmem:[%s770_s2 + $0x50] sm:$0xff]  ;;  %v39_v35 = vld [vmem:[%s770_s2 + $0x58] sm:$0xff]  ;;  %v473_v36 = vpack.c.bf16 %v62_v33, %v61_v32  ;;  %v63_v38 = vld [vmem:[%s771_s3 + $0x60] sm:$0xff] }
  0x13   :  { %v497_v37 = vpack.c.bf16 %v39_v35, %v38_v34  ;;  %v64_v39 = vld [vmem:[%s771_s3 + $0x68] sm:$0xff]  ;;  %v40_v40 = vld [vmem:[%s770_s2 + $0x60] sm:$0xff]  ;;  %v65_v44 = vld [vmem:[%s771_s3 + $0x70] sm:$0xff] }
  0x14   :  { %471 = vmatpush3.bf16.msra.mxu0 %v470_v30  ;;  %v41_v41 = vld [vmem:[%s770_s2 + $0x68] sm:$0xff]  ;;  %v476_v42 = vpack.c.bf16 %v64_v39, %v63_v38  ;;  %v66_v45 = vld [vmem:[%s771_s3 + $0x78] sm:$0xff]  ;;  %v42_v46 = vld [vmem:[%s770_s2 + $0x70] sm:$0xff] }
  0x15   :  { %495 = vmatpush3.bf16.msra.mxu1 %v494_v31  ;;  %472 = vmatprep.subr.bf16.mxu0 %v535_v3  ;;  %v500_v43 = vpack.c.bf16 %v41_v41, %v40_v40  ;;  %v43_v47 = vld [vmem:[%s770_s2 + $0x78] sm:$0xff]  ;;  %v479_v48 = vpack.c.bf16 %v66_v45, %v65_v44  ;;  %v44_v50 = vld [vmem:[%s769_s1] sm:$0xff]  ;;  %v45_v52 = vld [vmem:[%s769_s1 + $0x8] sm:$0xff] }
  0x16   :  { %496 = vmatprep.subr.bf16.mxu1 %v535_v3  ;;  %v503_v49 = vpack.c.bf16 %v43_v47, %v42_v46  ;;  %v21_v51 = vld [vmem:[%s768_s0] sm:$0xff]  ;;  %v22_v53 = vld [vmem:[%s768_s0 + $0x8] sm:$0xff]  ;;  %v46_v54 = vld [vmem:[%s769_s1 + $0x10] sm:$0xff] }
  0x17   :  { %v23_v55 = vld [vmem:[%s768_s0 + $0x10] sm:$0xff]  ;;  %v47_v56 = vld [vmem:[%s769_s1 + $0x18] sm:$0xff]  ;;  %v48_v58 = vld [vmem:[%s769_s1 + $0x20] sm:$0xff] }
  0x18   :  { %474 = vmatpush3.bf16.msra.mxu0 %v473_v36  ;;  %v24_v57 = vld [vmem:[%s768_s0 + $0x18] sm:$0xff]  ;;  %v25_v59 = vld [vmem:[%s768_s0 + $0x20] sm:$0xff]  ;;  %v49_v60 = vld [vmem:[%s769_s1 + $0x28] sm:$0xff] }
  0x19   :  { %498 = vmatpush3.bf16.msra.mxu1 %v497_v37  ;;  %475 = vmatprep.subr.bf16.mxu0 %v535_v3  ;;  %v26_v61 = vld [vmem:[%s768_s0 + $0x28] sm:$0xff]  ;;  %v50_v62 = vld [vmem:[%s769_s1 + $0x30] sm:$0xff]  ;;  %v304_v2 = vld [vmem:[%s772_s4] ss:$0 sm:$0xff] }
  0x1a   :  { %499 = vmatprep.subr.bf16.mxu1 %v535_v3  ;;  %v27_v63 = vld [vmem:[%s768_s0 + $0x30] sm:$0xff]  ;;  %s538_s0 = smov [#allocation2]  }
  0x1b   :  { %s293_s1 = sshll.u32 %s538_s0, 4  ;;  %s294_s1 = int_to_ptr.vmem [resolvable:$true] %s293_s1 }
  0x1c   :  { %477 = vmatpush3.bf16.msra.mxu0 %v476_v42  ;;  %s511_s4 = scalar_lea.vmem %s294_s1, 896  ;;  %p516_p1 = scmp.lt.s32.totalorder %s294_s1, %s294_s1 }
  0x1d   :  { %501 = vmatpush3.bf16.msra.mxu1 %v500_v43  ;;  %478 = vmatprep.subr.bf16.mxu0 %v535_v3  ;;  %p512_p0 = scmp.ne.s32.totalorder %s294_s1, %s511_s4  ;;  %p517_p2 = scmp.lt.s32.totalorder %s511_s4, %s511_s4 }
  0x1e   :  { %502 = vmatprep.subr.bf16.mxu1 %v535_v3 }
  0x1f   :  { %p518_p3 = por %p517_p2, %p516_p1 }
  0x20   :  { %480 = vmatpush3.bf16.msra.mxu0 %v479_v48 }
  0x21   :  { %504 = vmatpush3.bf16.msra.mxu1 %v503_v49  ;;  %p519_p4 = pnand %p518_p3, %p512_p0 }
  0x23   :  { %384 = vmatmul.mubr.f32.vlgmr.msra.gmra.mrb[0].mxu0 %v44_v50 }
  0x24   :  { %437 = vmatmul.mubr.f32.vlgmr.msra.gmra.mrb[0].mxu1 %v21_v51  ;;  %386 = vmatprep.mubr.msk.f32.mxu0 %vm536_vm0, %v537_v11 }
  0x25   :  { %439 = vmatprep.mubr.msk.f32.mxu1 %vm536_vm0, %v537_v11 }
  0x27   :  { %387 = vmatmul.mubr.f32.gmra.mrb[2].mxu0 %v45_v52 }
  0x28   :  { %440 = vmatmul.mubr.f32.gmra.mrb[2].mxu1 %v22_v53  ;;  %389 = vmatprep.mubr.msk.f32.mxu0 %vm536_vm0, %v537_v11 }
  0x29   :  { %442 = vmatprep.mubr.msk.f32.mxu1 %vm536_vm0, %v537_v11 }
  0x2b   :  { %390 = vmatmul.mubr.f32.gmra.mrb[4].mxu0 %v46_v54 }
  0x2c   :  { %443 = vmatmul.mubr.f32.gmra.mrb[4].mxu1 %v23_v55  ;;  %392 = vmatprep.mubr.msk.f32.mxu0 %vm536_vm0, %v537_v11 }
  0x2d   :  { %445 = vmatprep.mubr.msk.f32.mxu1 %vm536_vm0, %v537_v11 }
  0x2f   :  { %393 = vmatmul.mubr.f32.gmra.mrb[6].mxu0 %v47_v56 }
  0x30   :  { %446 = vmatmul.mubr.f32.gmra.mrb[6].mxu1 %v24_v57  ;;  %395 = vmatprep.mubr.msk.f32.mxu0 %vm536_vm0, %v537_v11 }
  0x31   :  { %448 = vmatprep.mubr.msk.f32.mxu1 %vm536_vm0, %v537_v11 }
  0x33   :  { %396 = vmatmul.mubr.f32.gmra.mrb[8].mxu0 %v48_v58 }
  0x34   :  { %449 = vmatmul.mubr.f32.gmra.mrb[8].mxu1 %v25_v59  ;;  %398 = vmatprep.mubr.msk.f32.mxu0 %vm536_vm0, %v537_v11 }
  0x35   :  { %451 = vmatprep.mubr.msk.f32.mxu1 %vm536_vm0, %v537_v11 }
  0x37   :  { %399 = vmatmul.mubr.f32.gmra.mrb[10].mxu0 %v49_v60 }
  0x38   :  { %452 = vmatmul.mubr.f32.gmra.mrb[10].mxu1 %v26_v61  ;;  %401 = vmatprep.mubr.msk.f32.mxu0 %vm536_vm0, %v537_v11 }
  0x39   :  { %454 = vmatprep.mubr.msk.f32.mxu1 %vm536_vm0, %v537_v11 }
  0x3b   :  { %402 = vmatmul.mubr.f32.gmra.mrb[12].mxu0 %v50_v62 }
  0x3c   :  { %455 = vmatmul.mubr.f32.gmra.mrb[12].mxu1 %v27_v63 }
  0xf6   :  { %v133_v0 = vpop.f32.mrb[0].mxu0 }
  0xf7   :  { %v233_v1 = vpop.f32.mrb[0].mxu1  ;;  %v385_v3 = vpop.f32.mrb[1].mxu0 }
  0xf8   :  { %v234_v4 = vadd.f32 %v233_v1, %v133_v0  ;;  %v438_v5 = vpop.f32.mrb[1].mxu1 }
  0xfa   :  { %v274_v6 = vadd.f32 %v304_v2, %v234_v4  ;;  %v138_v7 = vpop.f32.mrb[2].mxu0 }
  0xfb   :  { %v238_v8 = vpop.f32.mrb[2].mxu1  ;;  %v388_v9 = vpop.f32.mrb[3].mxu0 }
  0xfc   :  { %281 = vst [vmem:[#allocation2] sm:$0xff] %v274_v6  ;;  %v239_v10 = vadd.f32 %v238_v8, %v138_v7  ;;  %v441_v11 = vpop.f32.mrb[3].mxu1 }
  0xfe   :  { %v275_v12 = vadd.f32 %v304_v2, %v239_v10  ;;  %v143_v13 = vpop.f32.mrb[4].mxu0 }
  0xff   :  { %v243_v14 = vpop.f32.mrb[4].mxu1  ;;  %v391_v15 = vpop.f32.mrb[5].mxu0 }
 0x100   :  { %282 = vst [vmem:[#allocation2 + $0x8] sm:$0xff] %v275_v12  ;;  %v244_v16 = vadd.f32 %v243_v14, %v143_v13  ;;  %v444_v17 = vpop.f32.mrb[5].mxu1 }
 0x102   :  { %v276_v18 = vadd.f32 %v304_v2, %v244_v16  ;;  %v148_v19 = vpop.f32.mrb[6].mxu0 }
 0x103   :  { %v248_v20 = vpop.f32.mrb[6].mxu1  ;;  %v394_v21 = vpop.f32.mrb[7].mxu0 }
 0x104   :  { %283 = vst [vmem:[#allocation2 + $0x10] sm:$0xff] %v276_v18  ;;  %v249_v22 = vadd.f32 %v248_v20, %v148_v19  ;;  %v447_v23 = vpop.f32.mrb[7].mxu1 }
 0x106   :  { %v277_v24 = vadd.f32 %v304_v2, %v249_v22  ;;  %v153_v25 = vpop.f32.mrb[8].mxu0 }
 0x107   :  { %v253_v26 = vpop.f32.mrb[8].mxu1  ;;  %v397_v27 = vpop.f32.mrb[9].mxu0 }
 0x108   :  { %284 = vst [vmem:[#allocation2 + $0x18] sm:$0xff] %v277_v24  ;;  %v254_v28 = vadd.f32 %v253_v26, %v153_v25  ;;  %v450_v29 = vpop.f32.mrb[9].mxu1 }
 0x10a   :  { %v278_v30 = vadd.f32 %v304_v2, %v254_v28  ;;  %v158_v31 = vpop.f32.mrb[10].mxu0 }
 0x10b   :  { %v258_v32 = vpop.f32.mrb[10].mxu1  ;;  %v400_v33 = vpop.f32.mrb[11].mxu0 }
 0x10c   :  { %285 = vst [vmem:[#allocation2 + $0x20] sm:$0xff] %v278_v30  ;;  %v259_v34 = vadd.f32 %v258_v32, %v158_v31  ;;  %v453_v35 = vpop.f32.mrb[11].mxu1 }
 0x10e   :  { %v279_v36 = vadd.f32 %v304_v2, %v259_v34  ;;  %v163_v37 = vpop.f32.mrb[12].mxu0 }
 0x10f   :  { %v263_v38 = vpop.f32.mrb[12].mxu1  ;;  %v403_v39 = vpop.f32.mrb[13].mxu0 }
 0x110   :  { %286 = vst [vmem:[#allocation2 + $0x28] sm:$0xff] %v279_v36  ;;  %v264_v40 = vadd.f32 %v263_v38, %v163_v37  ;;  %v456_v41 = vpop.f32.mrb[13].mxu1 }
 0x112   :  { %v280_v42 = vadd.f32 %v304_v2, %v264_v40 }
 0x114   :  { %287 = vst [vmem:[#allocation2 + $0x30] sm:$0xff] %v280_v42 }
 0x115   :  { %522 = shalt.err (!%p519_p4)
}
 0x116   :  { %s523_s10 = scalar_lea.hbm %s773_s5, 896 }
 0x117   :  { %p524_p5 = scmp.ne.s32.totalorder %s773_s5, %s523_s10  ;;  %p527_p6 = scmp.lt.u32.totalorder %s523_s10, %s773_s5 }
 0x119   :  { %p529_p7 = pnand %p527_p6, %p524_p5 }
 0x11b   :  { %532 = shalt.err (!%p529_p7)
}
 0x11c   :  { %s539_s15 = smov 128   ;;  %s540_s16 = smov 8  }
 0x11d   :  { %299 = dma.vmem_to_hbm [thread:$0]  %s294_s1, 896, %s773_s5, [#allocation3], %s539_s15, %s539_s15, %s540_s16  }
 0x11e   :  { %533 = dma.done.wait [#allocation3], 896  }
 0x11f   :  { %534 = vsyncadd [#allocation3], 4294966400 }
 0x120   :  { %303 = vsyncpa [#allocation3], 1 }

// kernel: s2s_forward.10
= control target key start
LH: loop header
LB: loop body
LE: loop exit
PB: predicated region body
PF: predicated region fallthrough
CT: control target
= control target key end

     0   :  { %s2597_s24 = smov 0   ;;  %s3086_s0 = inlined_call_operand.vmem [shape: f32[7,8,384], index: 0, kind: input, shape index: {}]   ;;  %s3087_s1 = inlined_call_operand.vmem [shape: f32[8,8,128], index: 1, kind: input, shape index: {}]   ;;  %s3088_s2 = inlined_call_operand.vmem [shape: f32[8,128], index: 2, kind: input, shape index: {}]   ;;  %s3089_s3 = inlined_call_operand.vmem [shape: f32[128,384], index: 3, kind: input, shape index: {}]   ;;  %s3090_s4 = inlined_call_operand.vmem [shape: f32[128,384], index: 4, kind: input, shape index: {}]   ;;  %s3091_s5 = inlined_call_operand.vmem [shape: f32[1,384], index: 5, kind: input, shape index: {}]   ;;  %s3092_s6 = inlined_call_operand.vmem [shape: f32[7,8,128], index: 6, kind: output, shape index: {0}]   ;;  %s3093_s7 = inlined_call_operand.vmem [shape: f32[7,8,128], index: 7, kind: output, shape index: {1}]  }
   0x1 LB: > { %s2134_s25 = sadd.s32 4294967295, %s2551_s24   ;;  %p2138_p0 = scmp.ge.s32.totalorder %s2551_s24, 1  ;;  %s2551_s24 = sphi %s2597_s24, %s18_s24  }
   0x2   : > { %p240_p1 = scmp.lt.s32.totalorder %s2551_s24, 8 }
   0x4   : > { %p241_p2 = pnand %p2138_p0, %p240_p1 }
   0x5   : > { %p275_p3 = scmp.lt.s32.totalorder (!%p241_p2), %s2134_s25, 6  ;;  %p2142_p4 = scmp.ne.s32.totalorder (!%p241_p2), %s2134_s25, 0 }
   0x6   : > { %244 = sbr.rel (%p241_p2) target bundleno = 1083 (0x43b), region = 44 }
   0xd   : > { %s276_s26 = scalar_select %p275_p3, %s2134_s25, 6 }
   0xe   : > { %291 = sbr.rel (%p2142_p4) target bundleno = 21 (0x15), region = 48  ;;  %v292_v0 = vld [vmem:[%s3088_s2] sm:$0xff] (!%p2142_p4) }
   0xf   : > { %s2489_s27 = smul.u32 24, %s276_s26  ;;  %s2140_s28 = sshll.u32 %s276_s26, 3  ;;  %293 = vst [vmem:[#allocation2] sm:$0xff] (!%p2142_p4), %v292_v0 }
  0x10   : > { %s2608_s8 = scalar_lea.vmem %s3092_s6, %s2140_s28  ;;  %s2613_s11 = scalar_lea.vmem %s3093_s7, %s2140_s28 }
  0x11   : > { %s2618_s14 = scalar_lea.vmem %s3086_s0, %s2489_s27 }
  0x15 PF: > { %v295_v1 = vld [vmem:[%s3087_s1] sm:$0xff]  ;;  %v308_v2 = vlaneseq  ;;  %v2553_v3 = vmov 0.0   ;;  %vm2554_vm0 = vmmov 0   ;;  %v2555_v4 = vmov 1966171168   ;;  %v296_v6 = vld [vmem:[%s3087_s1 + $0x8] sm:$0xff] }
  0x16   : > { %2221 = vmatprep.subr.mxu0 %v2553_v3  ;;  %2223 = vmatprep.mubr.msk.f32.mxu0 %vm2554_vm0, %v2553_v3  ;;  %v306_v5 = vunpack.c.l.s4 %v2555_v4  ;;  %v2636_v9 = vld [vmem:[#allocation2] sm:$0xff]  ;;  %v2648_v14 = vld [vmem:[%s3087_s1 + $0x10] sm:$0xff]  ;;  %v2653_v19 = vld [vmem:[%s3087_s1 + $0x18] sm:$0xff]  ;;  %vm921_vm1 = vcmask 57344   ;;  %vm1010_vm2 = vcmask 64512   ;;  %vm1655_vm3 = vcmask 1041409  }
  0x17   : > { %2222 = vmatpush3.xpose.msra.mxu0 %v295_v1  ;;  %2226 = vmatprep.subr.mxu1 %v2553_v3  ;;  %v2633_v7 = vshrl.u32 %v308_v2, 7  ;;  %v304_v11 = vcombine.high %v2636_v9, %v2636_v9  ;;  %v2662_v21 = vld [vmem:[%s3087_s1 + $0x20] sm:$0xff]  ;;  %v2671_v24 = vld [vmem:[%s3087_s1 + $0x28] sm:$0xff]  ;;  %v2680_v25 = vld [vmem:[%s3087_s1 + $0x30] sm:$0xff]  ;;  %vm1658_vm4 = vcmask 1042434   ;;  %vm1661_vm5 = vcmask 1043459  }
  0x18   : > { %2231 = vmatprep.subr.mxu0 %v2553_v3  ;;  %v307_v8 = vunpack.c.0.s8 %v306_v5  ;;  %2227 = vmatpush3.xpose.msra.mxu1 %v296_v6  ;;  %v2689_v28 = vld [vmem:[%s3087_s1 + $0x38] sm:$0xff]  ;;  %vm1664_vm6 = vcmask 1044484   ;;  %vm1667_vm7 = vcmask 1045509   ;;  %vm1670_vm8 = vcmask 1046534  }
  0x19   : > { %2228 = vmatprep.mubr.msk.f32.mxu1 %vm2554_vm0, %v2553_v3  ;;  %2236 = vmatprep.subr.mxu1 %v2553_v3  ;;  %vm1673_vm9 = vcmask 1047559  }
  0x1a   : > { %v310_v10 = vsub.s32 %v307_v8, %v2633_v7 }
  0x1c   : > { %v311_v12 = vrot.slane %v2636_v9, %v310_v10  ;;  %v318_v16 = vrot.slane %v304_v11, %v310_v10 }
  0x1e   : > { %v327_v13 = vrot.slane %v311_v12, %v310_v10  ;;  %v319_v15 = vcombine.high %v311_v12, %v311_v12  ;;  %v320_v22 = vcombine.high %v318_v16, %v318_v16  ;;  %v334_v23 = vrot.slane %v318_v16, %v310_v10 }
  0x20   : > { %v349_v17 = vcombine.high %v327_v13, %v327_v13  ;;  %2224 = vmatmul.mubr.f32.vlgmr.msra.gmra.mrb[0].mxu0 %v327_v13  ;;  %v341_v18 = vrot.slane %v319_v15, %v310_v10  ;;  %v348_v26 = vrot.slane %v320_v22, %v310_v10  ;;  %v350_v27 = vcombine.high %v334_v23, %v334_v23 }
  0x21   : > { %2232 = vmatpush3.xpose.msra.mxu0 %v2648_v14  ;;  %2233 = vmatprep.mubr.msk.f32.mxu0 %vm2554_vm0, %v2553_v3 }
  0x22   : > { %v351_v20 = vcombine.high %v341_v18, %v341_v18  ;;  %2229 = vmatmul.mubr.f32.vlgmr.msra.gmra.mrb[0].mxu1 %v341_v18  ;;  %2241 = vmatprep.subr.mxu0 %v2553_v3  ;;  %v352_v29 = vcombine.high %v348_v26, %v348_v26 }
  0x23   : > { %2237 = vmatpush3.xpose.msra.mxu1 %v2653_v19  ;;  %2238 = vmatprep.mubr.msk.f32.mxu1 %vm2554_vm0, %v2553_v3 }
  0x24   : > { %2234 = vmatmul.mubr.f32.vlgmr.msra.gmra.mrb[2].mxu0 %v349_v17  ;;  %2246 = vmatprep.subr.mxu1 %v2553_v3 }
  0x25   : > { %2242 = vmatpush3.xpose.msra.mxu0 %v2662_v21  ;;  %2243 = vmatprep.mubr.msk.f32.mxu0 %vm2554_vm0, %v2553_v3 }
  0x26   : > { %2239 = vmatmul.mubr.f32.vlgmr.msra.gmra.mrb[2].mxu1 %v351_v20  ;;  %2251 = vmatprep.subr.mxu0 %v2553_v3 }
  0x27   : > { %2247 = vmatpush3.xpose.msra.mxu1 %v2671_v24  ;;  %2248 = vmatprep.mubr.msk.f32.mxu1 %vm2554_vm0, %v2553_v3 }
  0x28   : > { %2244 = vmatmul.mubr.f32.vlgmr.msra.gmra.mrb[4].mxu0 %v334_v23  ;;  %2256 = vmatprep.subr.mxu1 %v2553_v3 }
  0x29   : > { %2252 = vmatpush3.xpose.msra.mxu0 %v2680_v25  ;;  %2253 = vmatprep.mubr.msk.f32.mxu0 %vm2554_vm0, %v2553_v3 }
  0x2a   : > { %2249 = vmatmul.mubr.f32.vlgmr.msra.gmra.mrb[4].mxu1 %v348_v26  ;;  %2261 = vmatprep.subr.mxu0 %v2553_v3 }
  0x2b   : > { %2257 = vmatpush3.xpose.msra.mxu1 %v2689_v28  ;;  %2258 = vmatprep.mubr.msk.f32.mxu1 %vm2554_vm0, %v2553_v3 }
  0x2c   : > { %2254 = vmatmul.mubr.f32.vlgmr.msra.gmra.mrb[6].mxu0 %v350_v27  ;;  %2266 = vmatprep.subr.mxu1 %v2553_v3 }
  0x2d   : > { %2262 = vmatpush3.msra.mxu0 %v295_v1  ;;  %2263 = vmatprep.mubr.msk.f32.mxu0 %vm2554_vm0, %v2553_v3 }
  0x2e   : > { %2259 = vmatmul.mubr.f32.vlgmr.msra.gmra.mrb[6].mxu1 %v352_v29  ;;  %2271 = vmatprep.subr.mxu0 %v2553_v3 }
  0x2f   : > { %2267 = vmatpush3.msra.mxu1 %v296_v6  ;;  %2268 = vmatprep.mubr.msk.f32.mxu1 %vm2554_vm0, %v2553_v3 }
  0x30   : > { %2276 = vmatprep.subr.mxu1 %v2553_v3 }
  0xf3   : > { %v427_v30 = vpop.f32.mrb[0].mxu0 }
  0xf4   : > { %v2225_v31 = vpop.f32.mrb[1].mxu0  ;;  %v922_v32 = vsel %vm921_vm1, %v427_v30, -inf }
  0xf5   : > { %923 = vmax.xlane.f32.xlu0 %v922_v32  ;;  %v497_v33 = vpop.f32.mrb[0].mxu1 }
  0xf6   : > { %v2230_v34 = vpop.f32.mrb[1].mxu1  ;;  %v925_v35 = vsel %vm921_vm1, %v497_v33, -inf }
  0xf7   : > { %v567_v36 = vpop.f32.mrb[2].mxu0 }
  0xf8   : > { %v2235_v37 = vpop.f32.mrb[3].mxu0  ;;  %v928_v38 = vsel %vm921_vm1, %v567_v36, -inf }
  0xf9   : > { %929 = vmax.xlane.f32.xlu1 %v928_v38  ;;  %926 = vmax.xlane.f32.xlu0 %v925_v35  ;;  %v637_v39 = vpop.f32.mrb[2].mxu1 }
  0xfa   : > { %v2240_v40 = vpop.f32.mrb[3].mxu1  ;;  %v931_v41 = vsel %vm921_vm1, %v637_v39, -inf }
  0xfb   : > { %v707_v42 = vpop.f32.mrb[4].mxu0 }
  0xfc   : > { %v934_v43 = vsel %vm921_vm1, %v707_v42, -inf  ;;  %v2245_v44 = vpop.f32.mrb[5].mxu0 }
  0xfd   : > { %932 = vmax.xlane.f32.xlu1 %v931_v41  ;;  %935 = vmax.xlane.f32.xlu0 %v934_v43  ;;  %v777_v45 = vpop.f32.mrb[4].mxu1 }
  0xfe   : > { %v2250_v46 = vpop.f32.mrb[5].mxu1  ;;  %v937_v47 = vsel %vm921_vm1, %v777_v45, -inf }
  0xff   : > { %v847_v48 = vpop.f32.mrb[6].mxu0 }
 0x100   : > { %v940_v49 = vsel %vm921_vm1, %v847_v48, -inf  ;;  %v2255_v50 = vpop.f32.mrb[7].mxu0 }
 0x101   : > { %941 = vmax.xlane.f32.xlu0 %v940_v49  ;;  %938 = vmax.xlane.f32.xlu1 %v937_v47  ;;  %v917_v51 = vpop.f32.mrb[6].mxu1 }
 0x102   : > { %v2260_v52 = vpop.f32.mrb[7].mxu1  ;;  %v943_v53 = vsel %vm921_vm1, %v917_v51, -inf }
 0x105   : > { %944 = vmax.xlane.f32.xlu1 %v943_v53 }
 0x182   : > { %v924_v54 = vpop.xlane.xlu0 %923 }
 0x183   : > { %v946_v55 = vsub.f32 %v427_v30, %v924_v54  ;;  %v1602_v54 = vld [vmem:[%s3089_s3 + $0x20] sm:$0xff] }
 0x185   : > { %v954_v56 = vmul.f32 1.442695, %v946_v55 }
 0x186   : > { %v930_v57 = vpop.xlane.xlu1 %929  ;;  %v927_v58 = vpop.xlane.xlu0 %926 }
 0x187   : > { %2503 = vpow2.f32 %v954_v56  ;;  %v948_v59 = vsub.f32 %v567_v36, %v930_v57  ;;  %v947_v60 = vsub.f32 %v497_v33, %v927_v58 }
 0x189   : > { %v958_v61 = vmul.f32 1.442695, %v948_v59  ;;  %v956_v62 = vmul.f32 1.442695, %v947_v60  ;;  %v1605_v59 = vld [vmem:[%s3089_s3 + $0x38] sm:$0xff]  ;;  %v1608_v60 = vld [vmem:[%s3089_s3 + $0x50] sm:$0xff] }
 0x18a   : > { %v933_v63 = vpop.xlane.xlu1 %932  ;;  %v936_v0 = vpop.xlane.xlu0 %935 }
 0x18b   : > { %2505 = vpow2.f32 %v958_v61  ;;  %v949_v1 = vsub.f32 %v637_v39, %v933_v63  ;;  %v950_v2 = vsub.f32 %v707_v42, %v936_v0 }
 0x18c   : > { %2507 = vpow2.f32 %v956_v62 }
 0x18d   : > { %v960_v4 = vmul.f32 1.442695, %v949_v1  ;;  %v962_v5 = vmul.f32 1.442695, %v950_v2  ;;  %v1600_v1 = vld [vmem:[%s3089_s3 + $0x10] sm:$0xff] }
 0x18e   : > { %v942_v6 = vpop.xlane.xlu0 %941  ;;  %v939_v8 = vpop.xlane.xlu1 %938  ;;  %v1604_v2 = vld [vmem:[%s3089_s3 + $0x30] sm:$0xff] }
 0x18f   : > { %2509 = vpow2.f32 %v960_v4  ;;  %v952_v10 = vsub.f32 %v847_v48, %v942_v6  ;;  %v951_v11 = vsub.f32 %v777_v45, %v939_v8  ;;  %v1611_v6 = vld [vmem:[%s3089_s3 + $0x68] sm:$0xff]  ;;  %v1614_v8 = vld [vmem:[%s3089_s3 + $0x80] sm:$0xff] }
 0x190   : > { %2511 = vpow2.f32 %v962_v5  ;;  %v2375_v5 = vpack.c.bf16 %v1608_v60, %v1605_v59  ;;  %v1636_v60 = vld [vmem:[%s3089_s3 + $0x130] sm:$0xff] }
 0x191   : > { %v2504_v12 = vpop.eup %2503  ;;  %v966_v13 = vmul.f32 1.442695, %v952_v10  ;;  %v964_v15 = vmul.f32 1.442695, %v951_v11 }
 0x192   : > { %v945_v16 = vpop.xlane.xlu1 %944  ;;  %v970_v17 = vsel %vm921_vm1, %v2504_v12, 0.0 }
 0x193   : > { %2513 = vpow2.f32 %v966_v13  ;;  %v953_v18 = vsub.f32 %v917_v51, %v945_v16  ;;  %971 = vadd.xlane.f32.xlu0 %v970_v17  ;;  %v2379_v16 = vpack.c.bf16 %v1614_v8, %v1611_v6  ;;  %v1610_v17 = vld [vmem:[%s3089_s3 + $0x60] sm:$0xff]  ;;  %v1821_v8 = vld [vmem:[%s3090_s4 + $0x8] sm:$0xff] }
 0x194   : > { %2515 = vpow2.f32 %v964_v15  ;;  %v1606_v15 = vld [vmem:[%s3089_s3 + $0x40] sm:$0xff] }
 0x195   : > { %v2506_v20 = vpop.eup %2505  ;;  %v968_v22 = vmul.f32 1.442695, %v953_v18  ;;  %v1613_v18 = vld [vmem:[%s3089_s3 + $0x78] sm:$0xff] }
 0x196   : > { %v2508_v23 = vpop.eup %2507  ;;  %v976_v26 = vsel %vm921_vm1, %v2506_v20, 0.0 }
 0x197   : > { %2517 = vpow2.f32 %v968_v22  ;;  %977 = vadd.xlane.f32.xlu0 %v976_v26  ;;  %v973_v27 = vsel %vm921_vm1, %v2508_v23, 0.0  ;;  %v1617_v22 = vld [vmem:[%s3089_s3 + $0x98] sm:$0xff]  ;;  %v2381_v26 = vpack.c.bf16 %v1613_v18, %v1610_v17 }
 0x198   : > { %974 = vadd.xlane.f32.xlu1 %v973_v27 }
 0x199   : > { %v2510_v29 = vpop.eup %2509 }
 0x19a   : > { %v2512_v30 = vpop.eup %2511  ;;  %v979_v31 = vsel %vm921_vm1, %v2510_v29, 0.0 }
 0x19b   : > { %v982_v32 = vsel %vm921_vm1, %v2512_v30, 0.0 }
 0x19c   : > { %983 = vadd.xlane.f32.xlu0 %v982_v32  ;;  %980 = vadd.xlane.f32.xlu1 %v979_v31  ;;  %v1615_v31 = vld [vmem:[%s3089_s3 + $0x88] sm:$0xff] }
 0x19d   : > { %v2514_v33 = vpop.eup %2513 }
 0x19e   : > { %v2718_v34 = vpop.eup %2515  ;;  %v988_v35 = vsel %vm921_vm1, %v2514_v33, 0.0 }
 0x19f   : > { %v985_v36 = vsel %vm921_vm1, %v2718_v34, 0.0 }
 0x1a0   : > { %989 = vadd.xlane.f32.xlu0 %v988_v35  ;;  %986 = vadd.xlane.f32.xlu1 %v985_v36  ;;  %v1618_v36 = vld [vmem:[%s3089_s3 + $0xa0] sm:$0xff] }
 0x1a1   : > { %v2723_v37 = vpop.eup %2517 }
 0x1a2   : > { %v991_v38 = vsel %vm921_vm1, %v2723_v37, 0.0 }
 0x1a4   : > { %992 = vadd.xlane.f32.xlu1 %v991_v38 }
 0x220   : > { %v972_v39 = vpop.xlane.xlu0 %971 }
 0x221   : > { %2519 = vrcp.f32 %v972_v39  ;;  %v1623_v39 = vld [vmem:[%s3089_s3 + $0xc8] sm:$0xff] }
 0x224   : > { %v978_v40 = vpop.xlane.xlu0 %977 }
 0x225   : > { %2521 = vrcp.f32 %v978_v40  ;;  %v975_v41 = vpop.xlane.xlu1 %974  ;;  %v1626_v40 = vld [vmem:[%s3089_s3 + $0xe0] sm:$0xff] }
 0x226   : > { %2523 = vrcp.f32 %v975_v41  ;;  %v2387_v41 = vpack.c.bf16 %v1626_v40, %v1623_v39 }
 0x229   : > { %v984_v42 = vpop.xlane.xlu0 %983  ;;  %v981_v43 = vpop.xlane.xlu1 %980 }
 0x22a   : > { %2525 = vrcp.f32 %v984_v42  ;;  %v1622_v42 = vld [vmem:[%s3089_s3 + $0xc0] sm:$0xff] }
 0x22b   : > { %v2520_v44 = vpop.eup %2519  ;;  %2527 = vrcp.f32 %v981_v43  ;;  %v1625_v43 = vld [vmem:[%s3089_s3 + $0xd8] sm:$0xff] }
 0x22c   : > { %v1002_v45 = vmul.f32 %v2520_v44, %v2504_v12  ;;  %v2389_v44 = vpack.c.bf16 %v1625_v43, %v1622_v42  ;;  %v1820_v42 = vld [vmem:[%s3090_s4] sm:$0xff]  ;;  %v1823_v43 = vld [vmem:[%s3090_s4 + $0x18] sm:$0xff] }
 0x22d   : > { %v990_v46 = vpop.xlane.xlu0 %989  ;;  %v987_v47 = vpop.xlane.xlu1 %986 }
 0x22e   : > { %2529 = vrcp.f32 %v990_v46  ;;  %2264 = vmatmul.mubr.msk.f32.vlgmr.msra.gmra.mrb[8].mxu0 %vm1010_vm2, %v1002_v45  ;;  %v1624_v45 = vld [vmem:[%s3089_s3 + $0xd0] sm:$0xff]  ;;  %v1627_v46 = vld [vmem:[%s3089_s3 + $0xe8] sm:$0xff] }
 0x22f   : > { %v2522_v48 = vpop.eup %2521  ;;  %2531 = vrcp.f32 %v987_v47  ;;  %2272 = vmatpush3.msra.mxu0 %v2648_v14  ;;  %2273 = vmatprep.mubr.msk.f32.mxu0 %vm2554_vm0, %v2553_v3  ;;  %v1599_v14 = vld [vmem:[%s3089_s3 + $0x8] sm:$0xff]  ;;  %v2416_v47 = vpack.c.bf16 %v1627_v46, %v1624_v45 }
 0x230   : > { %v2524_v49 = vpop.eup %2523  ;;  %v1004_v50 = vmul.f32 %v2522_v48, %v2506_v20  ;;  %2281 = vmatprep.subr.mxu0 %v2553_v3  ;;  %v2371_v58 = vpack.c.bf16 %v1602_v54, %v1599_v14  ;;  %v2556_v20 = vmov 0.0|0.0   ;;  %v1629_v48 = vld [vmem:[%s3089_s3 + $0xf8] sm:$0xff]  ;;  %v1630_v14 = vld [vmem:[%s3089_s3 + $0x100] sm:$0xff]  ;;  %v1825_v45 = vld [vmem:[%s3090_s4 + $0x28] sm:$0xff] }
 0x231   : > { %v1003_v51 = vmul.f32 %v2524_v49, %v2508_v23  ;;  %v993_v52 = vpop.xlane.xlu1 %992  ;;  %v1620_v23 = vld [vmem:[%s3089_s3 + $0xb0] sm:$0xff]  ;;  %v1633_v54 = vld [vmem:[%s3089_s3 + $0x118] sm:$0xff] }
 0x232   : > { %2533 = vrcp.f32 %v993_v52  ;;  %2274 = vmatmul.mubr.msk.f32.vlgmr.msra.gmra.mrb[10].mxu0 %vm1010_vm2, %v1004_v50  ;;  %v1632_v49 = vld [vmem:[%s3089_s3 + $0x110] sm:$0xff]  ;;  %v1631_v52 = vld [vmem:[%s3089_s3 + $0x108] sm:$0xff] }
 0x233   : > { %2269 = vmatmul.mubr.msk.f32.vlgmr.msra.gmra.mrb[8].mxu1 %vm1010_vm2, %v1003_v51  ;;  %2282 = vmatpush3.msra.mxu0 %v2662_v21  ;;  %v1601_v21 = vld [vmem:[%s3089_s3 + $0x18] sm:$0xff]  ;;  %v2391_v50 = vpack.c.bf16 %v1632_v49, %v1629_v48  ;;  %v1628_v51 = vld [vmem:[%s3089_s3 + $0xf0] sm:$0xff] }
 0x234   : > { %v2526_v53 = vpop.eup %2525  ;;  %2277 = vmatpush3.msra.mxu1 %v2653_v19  ;;  %2278 = vmatprep.mubr.msk.f32.mxu1 %vm2554_vm0, %v2553_v3  ;;  %v1598_v19 = vld [vmem:[%s3089_s3] sm:$0xff]  ;;  %v1830_v48 = vld [vmem:[%s3090_s4 + $0x50] sm:$0xff] }
 0x235   : > { %v2528_v55 = vpop.eup %2527  ;;  %v1006_v56 = vmul.f32 %v2526_v53, %v2512_v30  ;;  %2283 = vmatprep.mubr.msk.f32.mxu0 %vm2554_vm0, %v2553_v3  ;;  %2286 = vmatprep.subr.mxu1 %v2553_v3  ;;  %v2373_v62 = vpack.c.bf16 %v1601_v21, %v1598_v19  ;;  %v1612_v30 = vld [vmem:[%s3089_s3 + $0x70] sm:$0xff]  ;;  %v2393_v53 = vpack.c.bf16 %v1631_v52, %v1628_v51  ;;  %v1638_v19 = vld [vmem:[%s3089_s3 + $0x140] sm:$0xff] }
 0x236   : > { %v1005_v57 = vmul.f32 %v2528_v55, %v2510_v29  ;;  %2291 = vmatprep.subr.mxu0 %v2553_v3  ;;  %v2383_v29 = vpack.c.bf16 %v1620_v23, %v1617_v22  ;;  %v2410_v32 = vpack.c.bf16 %v1615_v31, %v1612_v30  ;;  %v2419_v55 = vpack.c.bf16 %v1633_v54, %v1630_v14  ;;  %v1826_v14 = vld [vmem:[%s3090_s4 + $0x30] sm:$0xff] }
 0x237   : > { %2284 = vmatmul.mubr.msk.f32.vlgmr.msra.gmra.mrb[12].mxu0 %vm1010_vm2, %v1006_v56  ;;  %v1635_v56 = vld [vmem:[%s3089_s3 + $0x128] sm:$0xff] }
 0x238   : > { %v2530_v61 = vpop.eup %2529  ;;  %2279 = vmatmul.mubr.msk.f32.vlgmr.msra.gmra.mrb[10].mxu1 %vm1010_vm2, %v1005_v57  ;;  %2292 = vmatpush3.msra.mxu0 %v2680_v25  ;;  %v1607_v25 = vld [vmem:[%s3089_s3 + $0x48] sm:$0xff]  ;;  %v2395_v21 = vpack.c.bf16 %v1638_v19, %v1635_v56  ;;  %v1634_v57 = vld [vmem:[%s3089_s3 + $0x120] sm:$0xff] }
 0x239   : > { %v2532_v63 = vpop.eup %2531  ;;  %v1008_v0 = vmul.f32 %v2530_v61, %v2514_v33  ;;  %2287 = vmatpush3.msra.mxu1 %v2671_v24  ;;  %2288 = vmatprep.mubr.msk.f32.mxu1 %vm2554_vm0, %v2553_v3  ;;  %v1603_v24 = vld [vmem:[%s3089_s3 + $0x28] sm:$0xff]  ;;  %v2377_v11 = vpack.c.bf16 %v1607_v25, %v1604_v2  ;;  %v1616_v33 = vld [vmem:[%s3089_s3 + $0x90] sm:$0xff]  ;;  %v1828_v19 = vld [vmem:[%s3090_s4 + $0x40] sm:$0xff] }
 0x23a   : > { %v1007_v4 = vmul.f32 %v2532_v63, %v2718_v34  ;;  %2293 = vmatprep.mubr.msk.f32.mxu0 %vm2554_vm0, %v2553_v3  ;;  %2296 = vmatprep.subr.mxu1 %v2553_v3  ;;  %v2404_v13 = vpack.c.bf16 %v1603_v24, %v1600_v1  ;;  %v1619_v34 = vld [vmem:[%s3089_s3 + $0xa8] sm:$0xff]  ;;  %v1641_v63 = vld [vmem:[%s3089_s3 + $0x158] sm:$0xff]  ;;  %v1640_v2 = vld [vmem:[%s3089_s3 + $0x150] sm:$0xff] }
 0x23b   : > { %2294 = vmatmul.mubr.msk.f32.vlgmr.msra.gmra.mrb[14].mxu0 %vm1010_vm2, %v1008_v0  ;;  %2372 = vmatprep.subr.bf16.mxu0 %v2371_v58  ;;  %v2385_v35 = vpack.c.bf16 %v1619_v34, %v1616_v33  ;;  %v1637_v58 = vld [vmem:[%s3089_s3 + $0x138] sm:$0xff]  ;;  %v1639_v61 = vld [vmem:[%s3089_s3 + $0x148] sm:$0xff]  ;;  %v1644_v0 = vld [vmem:[%s3089_s3 + $0x170] sm:$0xff] }
 0x23c   : > { %v2534_v10 = vpop.eup %2533  ;;  %2289 = vmatmul.mubr.msk.f32.vlgmr.msra.gmra.mrb[12].mxu1 %vm1010_vm2, %v1007_v4  ;;  %2374 = vmatpush1.bf16.msra.mxu0 %v2373_v62  ;;  %v2397_v59 = vpack.c.bf16 %v1637_v58, %v1634_v57  ;;  %v2422_v62 = vpack.c.bf16 %v1639_v61, %v1636_v60  ;;  %v2399_v1 = vpack.c.bf16 %v1644_v0, %v1641_v63  ;;  %v1643_v25 = vld [vmem:[%s3089_s3 + $0x168] sm:$0xff]  ;;  %v1642_v24 = vld [vmem:[%s3089_s3 + $0x160] sm:$0xff]  ;;  %v1835_v0 = vld [vmem:[%s3090_s4 + $0x78] sm:$0xff] }
 0x23d   : > { %v1009_v12 = vmul.f32 %v2534_v10, %v2723_v37  ;;  %2297 = vmatpush3.msra.mxu1 %v2689_v28  ;;  %2298 = vmatprep.mubr.msk.f32.mxu1 %vm2554_vm0, %v2553_v3  ;;  %v1609_v28 = vld [vmem:[%s3089_s3 + $0x58] sm:$0xff]  ;;  %v2401_v4 = vpack.c.bf16 %v1643_v25, %v1640_v2  ;;  %v1824_v10 = vld [vmem:[%s3090_s4 + $0x20] sm:$0xff]  ;;  %v1829_v56 = vld [vmem:[%s3090_s4 + $0x48] sm:$0xff] }
 0x23e   : > { %2403 = vmatprep.subr.bf16.mxu1 %v2556_v20  ;;  %2376 = vmatprep.subr.bf16.mxu0 %v2375_v5  ;;  %v2407_v27 = vpack.c.bf16 %v1609_v28, %v1606_v15  ;;  %v1621_v37 = vld [vmem:[%s3089_s3 + $0xb8] sm:$0xff]  ;;  %v1833_v58 = vld [vmem:[%s3090_s4 + $0x68] sm:$0xff]  ;;  %v2433_v60 = vpack.c.bf16 %v1829_v56, %v1826_v14  ;;  %v1832_v61 = vld [vmem:[%s3090_s4 + $0x60] sm:$0xff] }
 0x23f   : > { %1740 = vmatprep.mubr.f32.mxu0 %v2553_v3  ;;  %v2413_v38 = vpack.c.bf16 %v1621_v37, %v1618_v36  ;;  %v1645_v5 = vld [vmem:[%s3089_s3 + $0x178] sm:$0xff]  ;;  %v1837_v2 = vld [vmem:[%s3090_s4 + $0x88] sm:$0xff] }
 0x240   : > { %2299 = vmatmul.mubr.msk.f32.vlgmr.msra.gmra.mrb[14].mxu1 %vm1010_vm2, %v1009_v12  ;;  %2378 = vmatpush1.bf16.msra.mxu0 %v2377_v11  ;;  %v2425_v6 = vpack.c.bf16 %v1645_v5, %v1642_v24  ;;  %v2427_v11 = vpack.c.bf16 %v1824_v10, %v1821_v8  ;;  %v1839_v25 = vld [vmem:[%s3090_s4 + $0x98] sm:$0xff]  ;;  %v2437_v24 = vpack.c.bf16 %v1835_v0, %v1832_v61  ;;  %v1838_v5 = vld [vmem:[%s3090_s4 + $0x90] sm:$0xff]  ;;  %v1841_v10 = vld [vmem:[%s3090_s4 + $0xa8] sm:$0xff] }
 0x241   : > { %2405 = vmatpush3.bf16.msra.mxu1 %v2404_v13  ;;  %2380 = vmatprep.subr.bf16.mxu0 %v2379_v16  ;;  %v1596_v61 = vld [vmem:[%s2618_s14 + $0x8] sm:$0xff] }
 0x242   : > { %2406 = vmatprep.subr.bf16.mxu1 %v2556_v20  ;;  %2333 = vmatprep.mubr.msk.f32.mxu1 %vm2554_vm0, %v2553_v3 }
 0x244   : > { %2382 = vmatpush1.bf16.msra.mxu0 %v2381_v26 }
 0x245   : > { %2408 = vmatpush3.bf16.msra.mxu1 %v2407_v27  ;;  %2384 = vmatprep.subr.bf16.mxu0 %v2383_v29 }
 0x246   : > { %2409 = vmatprep.subr.bf16.mxu1 %v2556_v20 }
 0x248   : > { %2386 = vmatpush1.bf16.msra.mxu0 %v2385_v35 }
 0x249   : > { %2411 = vmatpush3.bf16.msra.mxu1 %v2410_v32  ;;  %2388 = vmatprep.subr.bf16.mxu0 %v2387_v41 }
 0x24a   : > { %2412 = vmatprep.subr.bf16.mxu1 %v2556_v20 }
 0x24c   : > { %2390 = vmatpush1.bf16.msra.mxu0 %v2389_v44  ;;  %v1822_v44 = vld [vmem:[%s3090_s4 + $0x10] sm:$0xff] }
 0x24d   : > { %2414 = vmatpush3.bf16.msra.mxu1 %v2413_v38  ;;  %2392 = vmatprep.subr.bf16.mxu0 %v2391_v50  ;;  %v2460_v54 = vpack.c.bf16 %v1825_v45, %v1822_v44  ;;  %v1861_v44 = vld [vmem:[%s3090_s4 + $0x148] sm:$0xff]  ;;  %v1863_v45 = vld [vmem:[%s3090_s4 + $0x158] sm:$0xff] }
 0x24e   : > { %2415 = vmatprep.subr.bf16.mxu1 %v2556_v20 }
 0x250   : > { %2394 = vmatpush1.bf16.msra.mxu0 %v2393_v53  ;;  %v2429_v53 = vpack.c.bf16 %v1823_v43, %v1820_v42  ;;  %v1859_v42 = vld [vmem:[%s3090_s4 + $0x138] sm:$0xff]  ;;  %v1858_v43 = vld [vmem:[%s3090_s4 + $0x130] sm:$0xff] }
 0x251   : > { %2417 = vmatpush3.bf16.msra.mxu1 %v2416_v47  ;;  %2396 = vmatprep.subr.bf16.mxu0 %v2395_v21  ;;  %v1827_v47 = vld [vmem:[%s3090_s4 + $0x38] sm:$0xff] }
 0x252   : > { %2418 = vmatprep.subr.bf16.mxu1 %v2556_v20  ;;  %v1831_v21 = vld [vmem:[%s3090_s4 + $0x58] sm:$0xff] }
 0x254   : > { %2398 = vmatpush1.bf16.msra.mxu0 %v2397_v59  ;;  %v1836_v59 = vld [vmem:[%s3090_s4 + $0x80] sm:$0xff] }
 0x255   : > { %2420 = vmatpush3.bf16.msra.mxu1 %v2419_v55  ;;  %2400 = vmatprep.subr.bf16.mxu0 %v2399_v1  ;;  %v2431_v55 = vpack.c.bf16 %v1830_v48, %v1827_v47  ;;  %v2435_v63 = vpack.c.bf16 %v1836_v59, %v1833_v58  ;;  %v1834_v1 = vld [vmem:[%s3090_s4 + $0x70] sm:$0xff]  ;;  %v1595_v59 = vld [vmem:[%s2618_s14] sm:$0xff] }
 0x256   : > { %2421 = vmatprep.subr.bf16.mxu1 %v2556_v20  ;;  %v1862_v48 = vld [vmem:[%s3090_s4 + $0x150] sm:$0xff] }
 0x258   : > { %2402 = vmatpush1.bf16.msra.mxu0 %v2401_v4  ;;  %v1842_v4 = vld [vmem:[%s3090_s4 + $0xb0] sm:$0xff] }
 0x259   : > { %2423 = vmatpush3.bf16.msra.mxu1 %v2422_v62  ;;  %2428 = vmatprep.subr.bf16.mxu0 %v2427_v11  ;;  %v2463_v62 = vpack.c.bf16 %v1831_v21, %v1828_v19  ;;  %v2439_v8 = vpack.c.bf16 %v1842_v4, %v1839_v25  ;;  %v1843_v11 = vld [vmem:[%s3090_s4 + $0xb8] sm:$0xff]  ;;  %v1872_v19 = vsub.s32 0, %v2633_v7  ;;  %v1868_v21 = vld [vmem:[%s3091_s5] sm:$0x7] }
 0x25a   : > { %2424 = vmatprep.subr.bf16.mxu1 %v2556_v20 }
 0x25b   : > { %v1873_v58 = vrot.slane %v1868_v21, %v1872_v19 }
 0x25d   : > { %2426 = vmatpush3.bf16.msra.mxu1 %v2425_v6  ;;  %v2466_v6 = vpack.c.bf16 %v1837_v2, %v1834_v1 }
 0x25e   : > { %2459 = vmatprep.subr.bf16.mxu1 %v2556_v20 }
 0x301   : > { %v1080_v12 = vpop.f32.mrb[8].mxu0 }
 0x302   : > { %v2265_v13 = vpop.f32.mrb[9].mxu0 }
 0x303   : > { %v1848_v13 = vld [vmem:[%s3090_s4 + $0xe0] sm:$0xff] }
 0x305   : > { %v1226_v15 = vpop.f32.mrb[10].mxu0 }
 0x306   : > { %v1153_v16 = vpop.f32.mrb[8].mxu1  ;;  %v1657_v17 = vrot.slane %v1226_v15, 6  ;;  %v2275_v18 = vpop.f32.mrb[11].mxu0  ;;  %v2441_v15 = vpack.c.bf16 %v1841_v10, %v1838_v5  ;;  %v1880_v10 = vsub.s32 2, %v2633_v7 }
 0x307   : > { %v1654_v28 = vrot.slane %v1153_v16, 7  ;;  %v2270_v22 = vpop.f32.mrb[9].mxu1  ;;  %v1844_v16 = vld [vmem:[%s3090_s4 + $0xc0] sm:$0xff] }
 0x308   : > { %v1846_v22 = vld [vmem:[%s3090_s4 + $0xd0] sm:$0xff] }
 0x309   : > { %v1656_v23 = vsel %vm1655_vm3, %v1654_v28, %v1080_v12  ;;  %v1845_v12 = vld [vmem:[%s3090_s4 + $0xc8] sm:$0xff]  ;;  %v1847_v28 = vld [vmem:[%s3090_s4 + $0xd8] sm:$0xff] }
 0x30a   : > { %v1659_v26 = vsel %vm1658_vm4, %v1657_v17, %v1656_v23  ;;  %v1372_v27 = vpop.f32.mrb[12].mxu0  ;;  %v2443_v18 = vpack.c.bf16 %v1848_v13, %v1845_v12  ;;  %v1849_v23 = vld [vmem:[%s3090_s4 + $0xe8] sm:$0xff] }
 0x30b   : > { %v1299_v29 = vpop.f32.mrb[10].mxu1  ;;  %v1663_v30 = vrot.slane %v1372_v27, 4  ;;  %v2285_v31 = vpop.f32.mrb[13].mxu0  ;;  %v1854_v27 = vld [vmem:[%s3090_s4 + $0x110] sm:$0xff] }
 0x30c   : > { %v1660_v32 = vrot.slane %v1299_v29, 5  ;;  %v2280_v33 = vpop.f32.mrb[11].mxu1  ;;  %v2445_v29 = vpack.c.bf16 %v1847_v28, %v1844_v16  ;;  %v2472_v31 = vpack.c.bf16 %v1849_v23, %v1846_v22 }
 0x30d   : > { %v1853_v33 = vld [vmem:[%s3090_s4 + $0x108] sm:$0xff] }
 0x30e   : > { %v1662_v34 = vsel %vm1661_vm5, %v1660_v32, %v1659_v26  ;;  %v1518_v35 = vpop.f32.mrb[14].mxu0  ;;  %v1851_v26 = vld [vmem:[%s3090_s4 + $0xf8] sm:$0xff] }
 0x30f   : > { %v1665_v36 = vsel %vm1664_vm6, %v1663_v30, %v1662_v34  ;;  %v1445_v37 = vpop.f32.mrb[12].mxu1  ;;  %v1669_v38 = vrot.slane %v1518_v35, 2  ;;  %v2295_v39 = vpop.f32.mrb[15].mxu0  ;;  %v1850_v30 = vld [vmem:[%s3090_s4 + $0xf0] sm:$0xff]  ;;  %v2447_v32 = vpack.c.bf16 %v1854_v27, %v1851_v26  ;;  %v1852_v34 = vld [vmem:[%s3090_s4 + $0x100] sm:$0xff]  ;;  %v1855_v35 = vld [vmem:[%s3090_s4 + $0x118] sm:$0xff] }
 0x310   : > { %v1666_v40 = vrot.slane %v1445_v37, 3  ;;  %v2290_v41 = vpop.f32.mrb[13].mxu1  ;;  %v1860_v37 = vld [vmem:[%s3090_s4 + $0x140] sm:$0xff] }
 0x311   : > { %v1856_v39 = vld [vmem:[%s3090_s4 + $0x120] sm:$0xff] }
 0x312   : > { %v1668_v46 = vsel %vm1667_vm7, %v1666_v40, %v1665_v36  ;;  %v1857_v36 = vld [vmem:[%s3090_s4 + $0x128] sm:$0xff]  ;;  %v2475_v40 = vpack.c.bf16 %v1855_v35, %v1852_v34  ;;  %v2453_v47 = vpack.c.bf16 %v1859_v42, %v1856_v39 }
 0x313   : > { %v1671_v49 = vsel %vm1670_vm8, %v1669_v38, %v1668_v46  ;;  %v1591_v50 = vpop.f32.mrb[14].mxu1  ;;  %v2449_v38 = vpack.c.bf16 %v1853_v33, %v1850_v30  ;;  %v2451_v41 = vpack.c.bf16 %v1860_v37, %v1857_v36  ;;  %v1866_v46 = vld [vmem:[%s3090_s4 + $0x170] sm:$0xff] }
 0x314   : > { %v1672_v51 = vrot.slane %v1591_v50, 1  ;;  %v2300_v52 = vpop.f32.mrb[15].mxu1  ;;  %v2455_v50 = vpack.c.bf16 %v1866_v46, %v1863_v45 }
 0x315   : > { %v1864_v52 = vld [vmem:[%s3090_s4 + $0x160] sm:$0xff] }
 0x316   : > { %v1674_v57 = vsel %vm1673_vm9, %v1672_v51, %v1671_v49  ;;  %v2478_v49 = vpack.c.bf16 %v1861_v44, %v1858_v43  ;;  %v1865_v51 = vld [vmem:[%s3090_s4 + $0x168] sm:$0xff] }
 0x317   : > { %1741 = vmatmul.mubr.f32.vlgmr.msra.gmra.mrb[16].mxu0 %v1674_v57  ;;  %2049 = vst [vmem:[%s2613_s11] sm:$0xff] %v1674_v57  ;;  %2334 = vmatmul.mubr.f32.vlgmr.msra.gmra.mrb[16].mxu1 %v1674_v57  ;;  %v2457_v14 = vpack.c.bf16 %v1865_v51, %v1862_v48  ;;  %v1876_v57 = vsub.s32 1, %v2633_v7 }
 0x318   : > { %2430 = vmatpush1.bf16.msra.mxu0 %v2429_v53  ;;  %2461 = vmatpush3.bf16.msra.mxu1 %v2460_v54  ;;  %v1867_v53 = vld [vmem:[%s3090_s4 + $0x178] sm:$0xff] }
 0x319   : > { %2432 = vmatprep.subr.bf16.mxu0 %v2431_v55  ;;  %2462 = vmatprep.subr.bf16.mxu1 %v2556_v20  ;;  %v2481_v54 = vpack.c.bf16 %v1867_v53, %v1864_v52 }
 0x31a   : > { %1949 = vmatprep.mubr.f32.mxu0 %v2553_v3  ;;  %2368 = vmatprep.mubr.msk.f32.mxu1 %vm2554_vm0, %v2553_v3  ;;  %v1840_v3 = vld [vmem:[%s3090_s4 + $0xa0] sm:$0xff] }
 0x31b   : > { %v2469_v17 = vpack.c.bf16 %v1843_v11, %v1840_v3  ;;  %v1881_v3 = vrot.slane %v1868_v21, %v1880_v10 }
 0x31c   : > { %2434 = vmatpush1.bf16.msra.mxu0 %v2433_v60  ;;  %2464 = vmatpush3.bf16.msra.mxu1 %v2463_v62  ;;  %v1877_v60 = vrot.slane %v1868_v21, %v1876_v57 }
 0x31d   : > { %2436 = vmatprep.subr.bf16.mxu0 %v2435_v63  ;;  %2465 = vmatprep.subr.bf16.mxu1 %v2556_v20 }
 0x31e   : > { %v2485_v63 = vadd.f32 %v1877_v60, %v1596_v61 }
 0x320   : > { %2438 = vmatpush1.bf16.msra.mxu0 %v2437_v24  ;;  %2467 = vmatpush3.bf16.msra.mxu1 %v2466_v6 }
 0x321   : > { %2440 = vmatprep.subr.bf16.mxu0 %v2439_v8  ;;  %2468 = vmatprep.subr.bf16.mxu1 %v2556_v20 }
 0x324   : > { %2442 = vmatpush1.bf16.msra.mxu0 %v2441_v15  ;;  %2470 = vmatpush3.bf16.msra.mxu1 %v2469_v17  ;;  %v1597_v15 = vld [vmem:[%s2618_s14 + $0x10] sm:$0xff] }
 0x325   : > { %2444 = vmatprep.subr.bf16.mxu0 %v2443_v18  ;;  %2471 = vmatprep.subr.bf16.mxu1 %v2556_v20 }
 0x328   : > { %2446 = vmatpush1.bf16.msra.mxu0 %v2445_v29  ;;  %2473 = vmatpush3.bf16.msra.mxu1 %v2472_v31 }
 0x329   : > { %2448 = vmatprep.subr.bf16.mxu0 %v2447_v32  ;;  %2474 = vmatprep.subr.bf16.mxu1 %v2556_v20 }
 0x32c   : > { %2450 = vmatpush1.bf16.msra.mxu0 %v2449_v38  ;;  %2476 = vmatpush3.bf16.msra.mxu1 %v2475_v40 }
 0x32d   : > { %2452 = vmatprep.subr.bf16.mxu0 %v2451_v41  ;;  %2477 = vmatprep.subr.bf16.mxu1 %v2556_v20 }
 0x330   : > { %2454 = vmatpush1.bf16.msra.mxu0 %v2453_v47  ;;  %2479 = vmatpush3.bf16.msra.mxu1 %v2478_v49 }
 0x331   : > { %2456 = vmatprep.subr.bf16.mxu0 %v2455_v50  ;;  %2480 = vmatprep.subr.bf16.mxu1 %v2556_v20  ;;  %v2483_v20 = vadd.f32 %v1873_v58, %v1595_v59 }
 0x334   : > { %2458 = vmatpush1.bf16.msra.mxu0 %v2457_v14  ;;  %2482 = vmatpush3.bf16.msra.mxu1 %v2481_v54 }
 0x337   : > { %1950 = vmatmul.mubr.f32.vlgmr.msra.gmra.mrb[16].mxu0 %v2636_v9  ;;  %2369 = vmatmul.mubr.f32.vlgmr.msra.gmra.mrb[18].mxu1 %v2636_v9 }
 0x3ea   : > { %v1813_v55 = vpop.f32.mrb[16].mxu1 }
 0x3eb   : > { %v2335_v56 = vpop.f32.mrb[17].mxu1  ;;  %v1819_v17 = vadd.f32 %v1813_v55, %v1597_v15 }
 0x40a   : > { %v1951_v62 = vpop.f32.mrb[16].mxu0  ;;  %v2022_v0 = vpop.f32.mrb[18].mxu1 }
 0x40b   : > { %v2484_v1 = vadd.f32 %v2483_v20, %v1951_v62  ;;  %v1953_v2 = vpop.f32.mrb[17].mxu0  ;;  %v2370_v25 = vpop.f32.mrb[19].mxu1  ;;  %v2023_v13 = vadd.f32 %v2022_v0, %v1881_v3 }
 0x40c   : > { %v2486_v24 = vadd.f32 %v2485_v63, %v1953_v2 }
 0x40d   : > { %v2151_v4 = vmul.f32 -1.442695, %v2484_v1 }
 0x40e   : > { %v2152_v5 = vmul.f32 -1.442695, %v2486_v24 }
 0x40f   : > { %2535 = vpow2.f32 %v2151_v4 }
 0x410   : > { %2537 = vpow2.f32 %v2152_v5 }
 0x419   : > { %v2536_v6 = vpop.eup %2535 }
 0x41a   : > { %v2030_v8 = vadd.f32 1.0, %v2536_v6  ;;  %v2538_v11 = vpop.eup %2537 }
 0x41b   : > { %v2037_v12 = vadd.f32 1.0, %v2538_v11 }
 0x41c   : > { %2539 = vrcp.f32 %v2030_v8 }
 0x41d   : > { %2541 = vrcp.f32 %v2037_v12 }
 0x426   : > { %v2540_v16 = vpop.eup %2539 }
 0x427   : > { %v2040_v18 = vmul.f32 %v2540_v16, %v2023_v13  ;;  %v2542_v22 = vpop.eup %2541 }
 0x428   : > { %v2043_v23 = vsub.f32 1.0, %v2542_v22  ;;  %v2045_v27 = vmul.f32 %v2542_v22, %v2636_v9 }
 0x429   : > { %v2041_v28 = vadd.f32 %v2040_v18, %v1819_v17 }
 0x42b   : > { %2543 = vtanh.f32 %v2041_v28 }
 0x435   : > { %v2544_v26 = vpop.eup %2543 }
 0x436   : > { %v2044_v29 = vmul.f32 %v2544_v26, %v2043_v23 }
 0x438   : > { %v2046_v7 = vadd.f32 %v2045_v27, %v2044_v29 }
 0x43a   : > { %2047 = vst [vmem:[#allocation2] sm:$0xff] %v2046_v7  ;;  %2048 = vst [vmem:[%s2608_s8] sm:$0xff] %v2046_v7 }
 0x43b PF: > { %s18_s24 = sadd.s32 1, %s2551_s24  }
 0x43c   : > { %p15_p5 = scmp.ge.s32.totalorder %s18_s24, 9  }
 0x43e   :  { %17 = sbr.rel (!%p15_p5) target bundleno = 1 (0x1), region = 90 }

</bundles_post_ra>
